<compile_context>
chip_gen: v7x
topology: tpu7x:2x2x1
jax: 0.10.0
libtpu: 0.0.40
codegen_flags: <defaults>
</compile_context>

<pallas_src>
import numpy as np
import jax
import jax.numpy as jnp
from jax import lax
from jax.experimental import pallas as pl
from jax.experimental.pallas import tpu as pltpu


def _round_up(x, m):
    return ((x + m - 1) // m) * m


def _make_fused_kernel(tb, dpad, col_meta):
    """col_meta: list of (row_off, nnz_pad, lane_off, dim, card) per column."""
    n_cols = len(col_meta)

    def kernel(*refs):
        seg_ref = refs[0]                      # VMEM i32[1, TOTAL_NNZ]  (lane-major)
        out_ref = refs[1 + 2 * n_cols]         # VMEM f32[TB, DPAD]
        gat_ref = refs[2 + 2 * n_cols]         # VMEM f32[TOTAL_NNZ, DPAD] scratch

        # --- one-time gather of all embedding rows into the block-diagonal ---
        # --- "gathered" scratch (persists across grid steps)               ---
        @pl.when(pl.program_id(0) == 0)
        def _init():
            gat_ref[...] = jnp.zeros_like(gat_ref)
            for c in range(n_cols):
                row_off, nnz_pad, lane_off, dim, card = col_meta[c]
                val_ref = refs[1 + 2 * c]      # VMEM i32[nnz_pad, 1] (sublane-major)
                tbl_ref = refs[2 + 2 * c]      # VMEM f32[card, dim]
                cat_iota = lax.broadcasted_iota(jnp.int32, (1, card), 1)
                onehot = (val_ref[...] == cat_iota).astype(jnp.float32)
                # gathered rows for column c == table_c[values_c]  (exact).
                gat_ref[row_off:row_off + nnz_pad, lane_off:lane_off + dim] = jnp.dot(
                    onehot, tbl_ref[...], preferred_element_type=jnp.float32,
                    precision=lax.Precision.HIGHEST)

        # --- per batch-tile: one big MXU matmul produces ALL columns at once --
        tile_start = pl.program_id(0) * tb
        bag_ids = tile_start + lax.broadcasted_iota(jnp.int32, (tb, 1), 0)
        # A[t, j] = 1 iff value j belongs to bag (tile_start + t).  Padded value
        # slots carry segment id -1 and never match; padded/empty bags get all-
        # zero rows -> zero output rows.
        a = (seg_ref[...] == bag_ids).astype(jnp.float32)        # (TB, TOTAL_NNZ)
        out_ref[...] = jnp.dot(a, gat_ref[...],
                               preferred_element_type=jnp.float32,
                               precision=lax.Precision.HIGHEST)  # (TB, DPAD)

    return kernel


def multihot_embeddingbag_sum(columns, tables, *, max_tile=256):
    """Fused EmbeddingBag(mode='sum') + concat for all columns.

    columns: list of (values int[nnz], offsets int[batch, 1]) per column.
    tables:  list of float32[card, dim] embedding tables (same order).
    Returns float32[batch, sum(dims)].
    """
    batch = int(columns[0][1].shape[0])
    dims = [int(t.shape[1]) for t in tables]
    total_dim = sum(dims)
    dpad = _round_up(max(total_dim, 128), 128)     # lane-dense output slab

    tb = min(int(max_tile), _round_up(batch, 8))   # big batch tile -> MXU rows
    batch_pad = _round_up(batch, tb)

    seg_parts = []
    flat_inputs = []
    in_specs = []
    col_meta = []
    row_off = 0
    lane_off = 0
    tables_bytes = 0
    for (values, offsets), table in zip(columns, tables):
        card, dim = int(table.shape[0]), int(table.shape[1])
        offs = offsets[:, 0].astype(jnp.int32)
        values = values.astype(jnp.int32)
        nnz = int(values.shape[0])
        nnz_pad = _round_up(max(nnz, 128), 128)

        # Segment id (owning bag) of each value; pad with -1 so padded slots
        # never match any bag id.  Offsets are assumed non-decreasing
        # (NVTabular convention); empty bags are handled naturally.
        seg = jnp.searchsorted(offs, jnp.arange(nnz, dtype=jnp.int32),
                               side="right").astype(jnp.int32) - 1
        seg = jnp.concatenate([seg, jnp.full((nnz_pad - nnz,), -1, jnp.int32)])
        seg_parts.append(seg)

        vals = jnp.concatenate(
            [values, jnp.zeros((nnz_pad - nnz,), jnp.int32)]).reshape(nnz_pad, 1)
        flat_inputs += [vals, table.astype(jnp.float32)]
        in_specs += [
            pl.BlockSpec((nnz_pad, 1), lambda t: (0, 0)),
            pl.BlockSpec((card, dim), lambda t: (0, 0)),
        ]
        col_meta.append((row_off, nnz_pad, lane_off, dim, card))
        row_off += nnz_pad
        lane_off += dim
        tables_bytes += card * dim * 4

    total_nnz_pad = row_off
    seg_all = jnp.concatenate(seg_parts).reshape(1, total_nnz_pad)
    flat_inputs = [seg_all] + flat_inputs
    in_specs = [pl.BlockSpec((1, total_nnz_pad), lambda t: (0, 0))] + in_specs

    # VMEM budget: double-buffered inputs + output tile + gathered scratch,
    # with generous headroom, capped at v7x physical VMEM (64 MiB).
    vmem_need = (2 * total_nnz_pad * 4          # seg slab (x2 buffers)
                 + 2 * total_nnz_pad * 4        # values slabs
                 + 2 * tables_bytes             # tables
                 + 2 * tb * dpad * 4            # output tiles
                 + total_nnz_pad * dpad * 4)    # gathered scratch
    vmem_limit = int(min(64 * 1024 * 1024, max(32 * 1024 * 1024, 3 * vmem_need)))

    out = pl.pallas_call(
        _make_fused_kernel(tb, dpad, col_meta),
        out_shape=jax.ShapeDtypeStruct((batch_pad, dpad), jnp.float32),
        grid_spec=pltpu.PrefetchScalarGridSpec(
            num_scalar_prefetch=0,
            grid=(batch_pad // tb,),
            in_specs=in_specs,
            out_specs=pl.BlockSpec((tb, dpad), lambda t: (t, 0)),
            scratch_shapes=[pltpu.VMEM((total_nnz_pad, dpad), jnp.float32)],
        ),
        compiler_params=pltpu.CompilerParams(
            # "arbitrary": the gathered scratch is initialized at step 0 and
            # reused by later steps (cannot be sharded across cores as-is).
            dimension_semantics=("arbitrary",),
            vmem_limit_bytes=vmem_limit,
        ),
    )(*flat_inputs)
    return out[:batch, :total_dim]


class MultiHotEmbeddings:
    """JAX/Pallas port of nvtabular MultiHotEmbeddings (mode='sum')."""

    def __init__(self, embedding_table_shapes, dropout=0.0, mode="sum", *, key):
        assert mode == "sum", "only mode='sum' is implemented"
        self.embedding_names = list(embedding_table_shapes.keys())
        self.shapes = embedding_table_shapes
        self.dropout = dropout
        self.tables = {}
        for name in self.embedding_names:
            key, sub = jax.random.split(key)
            card, dim = embedding_table_shapes[name]
            # torch.nn.EmbeddingBag default init: N(0, 1).
            self.tables[name] = jax.random.normal(sub, (card, dim), jnp.float32)

    def __call__(self, x):
        columns = [x[name] for name in self.embedding_names]
        tables = [self.tables[name] for name in self.embedding_names]
        out = multihot_embeddingbag_sum(columns, tables)
        # TODO(synk): dropout > 0 (training mode) not implemented; p=0.0 -> identity.
        return out


def _reference(module, x):
    """Pure numpy reference of EmbeddingBag(sum) + concat, for verification."""
    parts = []
    for name in module.embedding_names:
        values, offsets = x[name]
        values = np.asarray(values)
        offs = np.asarray(offsets)[:, 0]
        table = np.asarray(module.tables[name])
        batch = offs.shape[0]
        dim = table.shape[1]
        ends = np.concatenate([offs[1:], [values.shape[0]]])
        out = np.zeros((batch, dim), np.float32)
        for b in range(batch):
            if ends[b] > offs[b]:
                out[b] = table[values[offs[b]:ends[b]]].sum(axis=0)
        parts.append(out)
    return np.concatenate(parts, axis=1)


if __name__ == "__main__":
    key = jax.random.PRNGKey(0)

    embedding_table_shapes = {"cat_a": (100, 16), "cat_b": (57, 8)}
    batch = 10   # not a multiple of 8 -> exercises bag-tile padding

    key, k_mod, k_va, k_vb = jax.random.split(key, 4)
    module = MultiHotEmbeddings(embedding_table_shapes, dropout=0.0, key=k_mod)

    # Deterministic bag lengths (cat_b includes empty bags).
    lengths_a = np.array([1, 2, 3, 4, 1, 2, 3, 4, 2, 1], np.int32)   # nnz = 23
    lengths_b = np.array([2, 0, 1, 3, 2, 0, 1, 3, 0, 2], np.int32)   # nnz = 14
    offsets_a = np.concatenate([[0], np.cumsum(lengths_a)[:-1]]).astype(np.int32)
    offsets_b = np.concatenate([[0], np.cumsum(lengths_b)[:-1]]).astype(np.int32)

    values_a = jax.random.randint(k_va, (int(lengths_a.sum()),), 0, 100, jnp.int32)
    values_b = jax.random.randint(k_vb, (int(lengths_b.sum()),), 0, 57, jnp.int32)

    x = {
        "cat_a": (values_a, jnp.asarray(offsets_a)[:, None]),
        "cat_b": (values_b, jnp.asarray(offsets_b)[:, None]),
    }

    ref = _reference(module, x)

    # 1) Default path (single large batch tile, grid=(1,)).
    out = module(x)
    out = jax.block_until_ready(out)
    assert out.shape == (batch, 16 + 8), out.shape
    np.testing.assert_allclose(np.asarray(out), ref, rtol=1e-4, atol=1e-4)

    # 2) Small-tile path (grid=(2,)): exercises the program_id==0 gather-init
    #    plus reuse of the persistent gathered scratch on later grid steps.
    columns = [x[name] for name in module.embedding_names]
    tables = [module.tables[name] for name in module.embedding_names]
    out2 = multihot_embeddingbag_sum(columns, tables, max_tile=8)
    out2 = jax.block_until_ready(out2)
    np.testing.assert_allclose(np.asarray(out2), ref, rtol=1e-4, atol=1e-4)

    print("KERNEL_OK")
</pallas_src>

<mosaic_0001>
module attributes {stable_mosaic.version = 11 : i64} {
  func.func @kernel(%arg0: i32, %arg1: memref<1x256xi32, #tpu.memory_space<vmem>>, %arg2: memref<128x1xi32, #tpu.memory_space<vmem>>, %arg3: memref<100x16xf32, #tpu.memory_space<vmem>>, %arg4: memref<128x1xi32, #tpu.memory_space<vmem>>, %arg5: memref<57x8xf32, #tpu.memory_space<vmem>>, %arg6: memref<16x128xf32, #tpu.memory_space<vmem>>, %arg7: memref<256x128xf32, #tpu.memory_space<vmem>>) attributes {dimension_semantics = [#tpu.dimension_semantics<arbitrary>], iteration_bounds = array<i64: 1>, scalar_prefetch = 0 : i64, scratch_operands = 1 : i64, tpu.core_type = #tpu.core_type<tc>, window_params = [{pipeline_mode = #tpu.pipeline_mode<synchronous>, transform_indices = @transform_0, window_bounds = array<i64: 1, 256>}, {pipeline_mode = #tpu.pipeline_mode<synchronous>, transform_indices = @transform_1, window_bounds = array<i64: 128, 1>}, {pipeline_mode = #tpu.pipeline_mode<synchronous>, transform_indices = @transform_2, window_bounds = array<i64: 100, 16>}, {pipeline_mode = #tpu.pipeline_mode<synchronous>, transform_indices = @transform_3, window_bounds = array<i64: 128, 1>}, {pipeline_mode = #tpu.pipeline_mode<synchronous>, transform_indices = @transform_4, window_bounds = array<i64: 57, 8>}, {transform_indices = @transform_5, window_bounds = array<i64: 16, 128>}]} {
    %c0_i32 = arith.constant 0 : i32
    %0 = arith.cmpi eq, %arg0, %c0_i32 : i32
    %1 = arith.extui %0 : i1 to i32
    %c0_i32_0 = arith.constant 0 : i32
    %2 = arith.cmpi ne, %1, %c0_i32_0 : i32
    scf.if %2 {
      %cst_6 = arith.constant 0.000000e+00 : f32
      %16 = vector.broadcast %cst_6 : f32 to vector<256x128xf32>
      %c0_7 = arith.constant 0 : index
      %c0_8 = arith.constant 0 : index
      %17 = vector.load %arg7[%c0_7, %c0_8] : memref<256x128xf32, #tpu.memory_space<vmem>>, vector<256x128xf32>
      tpu.vector_store %arg7[%c0_7, %c0_8], %16 {strides = array<i32>} : memref<256x128xf32, #tpu.memory_space<vmem>>, vector<256x128xf32>,
      %18 = tpu.iota {dimensions = array<i32: 1>} : vector<1x100xi32>
      %c0_9 = arith.constant 0 : index
      %c0_10 = arith.constant 0 : index
      %19 = vector.load %arg2[%c0_9, %c0_10] : memref<128x1xi32, #tpu.memory_space<vmem>>, vector<128x1xi32>
      %20 = vector.broadcast %19 : vector<128x1xi32> to vector<128x100xi32>
      %21 = vector.broadcast %18 : vector<1x100xi32> to vector<128x100xi32>
      %22 = arith.cmpi eq, %20, %21 : vector<128x100xi32>
      %23 = arith.extui %22 : vector<128x100xi1> to vector<128x100xi32>
      %24 = arith.sitofp %23 : vector<128x100xi32> to vector<128x100xf32>
      %c0_11 = arith.constant 0 : index
      %c0_12 = arith.constant 0 : index
      %25 = vector.load %arg3[%c0_11, %c0_12] : memref<100x16xf32, #tpu.memory_space<vmem>>, vector<100x16xf32>
      %cst_13 = arith.constant dense<0.000000e+00> : vector<128x16xf32>
      %26 = tpu.matmul %24, %25, %cst_13 {dimension_numbers = #tpu.dot_dimension_numbers<[1], [0], [0], [1], [0, 0, 1, 1], [], []>, precision = #tpu.contract_precision<fp32>} : vector<128x100xf32>, vector<100x16xf32>, vector<128x16xf32> -> vector<128x16xf32>
      %c0_14 = arith.constant 0 : index
      %c0_15 = arith.constant 0 : index
      %27 = vector.load %arg7[%c0_14, %c0_15] : memref<256x128xf32, #tpu.memory_space<vmem>>, vector<128x16xf32>
      tpu.vector_store %arg7[%c0_14, %c0_15], %26 {strides = array<i32>} : memref<256x128xf32, #tpu.memory_space<vmem>>, vector<128x16xf32>,
      %28 = tpu.iota {dimensions = array<i32: 1>} : vector<1x57xi32>
      %c0_16 = arith.constant 0 : index
      %c0_17 = arith.constant 0 : index
      %29 = vector.load %arg4[%c0_16, %c0_17] : memref<128x1xi32, #tpu.memory_space<vmem>>, vector<128x1xi32>
      %30 = vector.broadcast %29 : vector<128x1xi32> to vector<128x57xi32>
      %31 = vector.broadcast %28 : vector<1x57xi32> to vector<128x57xi32>
      %32 = arith.cmpi eq, %30, %31 : vector<128x57xi32>
      %33 = arith.extui %32 : vector<128x57xi1> to vector<128x57xi32>
      %34 = arith.sitofp %33 : vector<128x57xi32> to vector<128x57xf32>
      %c0_18 = arith.constant 0 : index
      %c0_19 = arith.constant 0 : index
      %35 = vector.load %arg5[%c0_18, %c0_19] : memref<57x8xf32, #tpu.memory_space<vmem>>, vector<57x8xf32>
      %cst_20 = arith.constant dense<0.000000e+00> : vector<128x8xf32>
      %36 = tpu.matmul %34, %35, %cst_20 {dimension_numbers = #tpu.dot_dimension_numbers<[1], [0], [0], [1], [0, 0, 1, 1], [], []>, precision = #tpu.contract_precision<fp32>} : vector<128x57xf32>, vector<57x8xf32>, vector<128x8xf32> -> vector<128x8xf32>
      %c128 = arith.constant 128 : index
      %c16 = arith.constant 16 : index
      %37 = vector.load %arg7[%c128, %c16] : memref<256x128xf32, #tpu.memory_space<vmem>>, vector<128x8xf32>
      tpu.vector_store %arg7[%c128, %c16], %36 {strides = array<i32>} : memref<256x128xf32, #tpu.memory_space<vmem>>, vector<128x8xf32>,
    } else {
    }
    %c16_i32 = arith.constant 16 : i32
    %3 = arith.muli %arg0, %c16_i32 : i32
    %4 = tpu.iota {dimensions = array<i32: 0>} : vector<16x1xi32>
    %5 = vector.broadcast %3 : i32 to vector<16x1xi32>
    %6 = arith.addi %5, %4 : vector<16x1xi32>
    %c0 = arith.constant 0 : index
    %c0_1 = arith.constant 0 : index
    %7 = vector.load %arg1[%c0, %c0_1] : memref<1x256xi32, #tpu.memory_space<vmem>>, vector<1x256xi32>
    %8 = vector.broadcast %7 : vector<1x256xi32> to vector<16x256xi32>
    %9 = vector.broadcast %6 : vector<16x1xi32> to vector<16x256xi32>
    %10 = arith.cmpi eq, %8, %9 : vector<16x256xi32>
    %11 = arith.extui %10 : vector<16x256xi1> to vector<16x256xi32>
    %12 = arith.sitofp %11 : vector<16x256xi32> to vector<16x256xf32>
    %c0_2 = arith.constant 0 : index
    %c0_3 = arith.constant 0 : index
    %13 = vector.load %arg7[%c0_2, %c0_3] : memref<256x128xf32, #tpu.memory_space<vmem>>, vector<256x128xf32>
    %cst = arith.constant dense<0.000000e+00> : vector<16x128xf32>
    %14 = tpu.matmul %12, %13, %cst {dimension_numbers = #tpu.dot_dimension_numbers<[1], [0], [0], [1], [0, 0, 1, 1], [], []>, precision = #tpu.contract_precision<fp32>} : vector<16x256xf32>, vector<256x128xf32>, vector<16x128xf32> -> vector<16x128xf32>
    %c0_4 = arith.constant 0 : index
    %c0_5 = arith.constant 0 : index
    %15 = vector.load %arg6[%c0_4, %c0_5] : memref<16x128xf32, #tpu.memory_space<vmem>>, vector<16x128xf32>
    tpu.vector_store %arg6[%c0_4, %c0_5], %14 {strides = array<i32>} : memref<16x128xf32, #tpu.memory_space<vmem>>, vector<16x128xf32>,
    return
  }
  func.func @transform_0(%arg0: i32) -> (i32, i32) {
    %c0_i32 = arith.constant 0 : i32
    %c0_i32_0 = arith.constant 0 : i32
    %c0_i32_1 = arith.constant 0 : i32
    return %c0_i32, %c0_i32_0 : i32, i32
  }
  func.func @transform_1(%arg0: i32) -> (i32, i32) {
    %c0_i32 = arith.constant 0 : i32
    %c0_i32_0 = arith.constant 0 : i32
    %c0_i32_1 = arith.constant 0 : i32
    return %c0_i32, %c0_i32_0 : i32, i32
  }
  func.func @transform_2(%arg0: i32) -> (i32, i32) {
    %c0_i32 = arith.constant 0 : i32
    %c0_i32_0 = arith.constant 0 : i32
    %c0_i32_1 = arith.constant 0 : i32
    return %c0_i32, %c0_i32_0 : i32, i32
  }
  func.func @transform_3(%arg0: i32) -> (i32, i32) {
    %c0_i32 = arith.constant 0 : i32
    %c0_i32_0 = arith.constant 0 : i32
    %c0_i32_1 = arith.constant 0 : i32
    return %c0_i32, %c0_i32_0 : i32, i32
  }
  func.func @transform_4(%arg0: i32) -> (i32, i32) {
    %c0_i32 = arith.constant 0 : i32
    %c0_i32_0 = arith.constant 0 : i32
    %c0_i32_1 = arith.constant 0 : i32
    return %c0_i32, %c0_i32_0 : i32, i32
  }
  func.func @transform_5(%arg0: i32) -> (i32, i32) {
    %c0_i32 = arith.constant 0 : i32
    %c0_i32_0 = arith.constant 0 : i32
    return %arg0, %c0_i32 : i32, i32
  }
}

</mosaic_0001>

<bundles_post_ra>
// kernel: tpu_custom_call.1
= control target key start
LH: loop header
LB: loop body
LE: loop exit
PB: predicated region body
PF: predicated region fallthrough
CT: control target
= control target key end

     0   :  { %v5789_v2 = vmov 0   ;;  %v7847_v3 = vmov 0.0   ;;  %vm1670_vm0 = vcmask 1040384   ;;  %s7816_s0 = inlined_call_operand.vmem [shape: s32[1,256], index: 0, kind: input, shape index: {}]   ;;  %s7817_s1 = inlined_call_operand.vmem [shape: s32[128,1], index: 1, kind: input, shape index: {}]   ;;  %s7818_s2 = inlined_call_operand.vmem [shape: f32[100,16], index: 2, kind: input, shape index: {}]   ;;  %s7819_s3 = inlined_call_operand.vmem [shape: s32[128,1], index: 3, kind: input, shape index: {}]   ;;  %s7820_s4 = inlined_call_operand.vmem [shape: f32[57,8], index: 4, kind: input, shape index: {}]   ;;  %s7821_s5 = inlined_call_operand.hbm [shape: f32[16,128], index: 5, kind: output, shape index: {}]  }
   0x1   :  { %v1503_v0 = vld [vmem:[%s7819_s3 + $0x10] sm:$0xff]  ;;  %v1501_v1 = vld [vmem:[%s7819_s3] sm:$0xff]  ;;  %5763 = vset.pattern.permute.xlu1 %v5789_v2  ;;  %5762 = vset.pattern.permute.xlu0 %v5789_v2  ;;  %25 = vst [vmem:[#allocation2] sm:$0xff] %v7847_v3  ;;  %26 = vst [vmem:[#allocation2 + $0x8] sm:$0xff] %v7847_v3 }
   0x2   :  { %1524 = vperm.xlu1 %5763, %v1503_v0   ;;  %1518 = vperm.xlu0 %5762, %v1501_v1   ;;  %27 = vst [vmem:[#allocation2 + $0x10] sm:$0xff] %v7847_v3  ;;  %28 = vst [vmem:[#allocation2 + $0x18] sm:$0xff] %v7847_v3  ;;  %v1504_v4 = vld [vmem:[%s7819_s3 + $0x18] sm:$0xff]  ;;  %v1502_v5 = vld [vmem:[%s7819_s3 + $0x8] sm:$0xff] }
   0x3   :  { %29 = vst [vmem:[#allocation2 + $0x20] sm:$0xff] %v7847_v3  ;;  %30 = vst [vmem:[#allocation2 + $0x28] sm:$0xff] %v7847_v3  ;;  %v1506_v6 = vld [vmem:[%s7819_s3 + $0x28] sm:$0xff]  ;;  %v1505_v7 = vld [vmem:[%s7819_s3 + $0x20] sm:$0xff] }
   0x4   :  { %31 = vst [vmem:[#allocation2 + $0x30] sm:$0xff] %v7847_v3  ;;  %32 = vst [vmem:[#allocation2 + $0x38] sm:$0xff] %v7847_v3  ;;  %v1508_v8 = vld [vmem:[%s7819_s3 + $0x38] sm:$0xff]  ;;  %v1507_v9 = vld [vmem:[%s7819_s3 + $0x30] sm:$0xff] }
   0x5   :  { %33 = vst [vmem:[#allocation2 + $0x40] sm:$0xff] %v7847_v3  ;;  %34 = vst [vmem:[#allocation2 + $0x48] sm:$0xff] %v7847_v3  ;;  %v1613_v10 = vld [vmem:[%s7820_s4] sm:$0xff]  ;;  %v1614_v11 = vld [vmem:[%s7820_s4 + $0x8] sm:$0xff] }
   0x6   :  { %35 = vst [vmem:[#allocation2 + $0x50] sm:$0xff] %v7847_v3  ;;  %36 = vst [vmem:[#allocation2 + $0x58] sm:$0xff] %v7847_v3  ;;  %1527 = vperm.xlu1 %5763, %v1504_v4   ;;  %1521 = vperm.xlu0 %5762, %v1502_v5   ;;  %v1675_v12 = vand.u32 4294901760, %v1613_v10  ;;  %v1615_v13 = vld [vmem:[%s7820_s4 + $0x10] sm:$0xff]  ;;  %v1616_v14 = vld [vmem:[%s7820_s4 + $0x18] sm:$0xff]  ;;  %v1678_v15 = vand.u32 4294901760, %v1614_v11 }
   0x7   :  { %37 = vst [vmem:[#allocation2 + $0x60] sm:$0xff] %v7847_v3  ;;  %38 = vst [vmem:[#allocation2 + $0x68] sm:$0xff] %v7847_v3  ;;  %v1681_v16 = vand.u32 4294901760, %v1615_v13  ;;  %v1684_v17 = vand.u32 4294901760, %v1616_v14  ;;  %v5897_v18 = vld [vmem:[%s7820_s4 + $0x20] sm:$0xff]  ;;  %v5902_v19 = vld [vmem:[%s7820_s4 + $0x28] sm:$0xff] }
   0x8   :  { %39 = vst [vmem:[#allocation2 + $0x70] sm:$0xff] %v7847_v3  ;;  %40 = vst [vmem:[#allocation2 + $0x78] sm:$0xff] %v7847_v3  ;;  %v1620_v20 = vld [vmem:[%s7820_s4 + $0x38] sm:$0x1]  ;;  %v1510_v21 = vld [vmem:[%s7819_s3 + $0x48] sm:$0xff]  ;;  %v5913_v23 = vpack.c.bf16 %v1678_v15, %v1675_v12 }
   0x9   :  { %41 = vst [vmem:[#allocation2 + $0x80] sm:$0xff] %v7847_v3  ;;  %42 = vst [vmem:[#allocation2 + $0x88] sm:$0xff] %v7847_v3  ;;  %v1509_v22 = vld [vmem:[%s7819_s3 + $0x40] sm:$0xff] }
   0xa   :  { %43 = vst [vmem:[#allocation2 + $0x90] sm:$0xff] %v7847_v3  ;;  %44 = vst [vmem:[#allocation2 + $0x98] sm:$0xff] %v7847_v3  ;;  %1533 = vperm.xlu1 %5763, %v1506_v6   ;;  %1530 = vperm.xlu0 %5762, %v1505_v7  }
   0xb   :  { %45 = vst [vmem:[#allocation2 + $0xa0] sm:$0xff] %v7847_v3  ;;  %46 = vst [vmem:[#allocation2 + $0xa8] sm:$0xff] %v7847_v3 }
   0xc   :  { %47 = vst [vmem:[#allocation2 + $0xb0] sm:$0xff] %v7847_v3  ;;  %48 = vst [vmem:[#allocation2 + $0xb8] sm:$0xff] %v7847_v3 }
   0xd   :  { %49 = vst [vmem:[#allocation2 + $0xc0] sm:$0xff] %v7847_v3  ;;  %50 = vst [vmem:[#allocation2 + $0xc8] sm:$0xff] %v7847_v3 }
   0xe   :  { %51 = vst [vmem:[#allocation2 + $0xd0] sm:$0xff] %v7847_v3  ;;  %52 = vst [vmem:[#allocation2 + $0xd8] sm:$0xff] %v7847_v3  ;;  %1539 = vperm.xlu1 %5763, %v1508_v8   ;;  %1536 = vperm.xlu0 %5762, %v1507_v9  }
   0xf   :  { %53 = vst [vmem:[#allocation2 + $0xe0] sm:$0xff] %v7847_v3  ;;  %54 = vst [vmem:[#allocation2 + $0xe8] sm:$0xff] %v7847_v3 }
  0x10   :  { %55 = vst [vmem:[#allocation2 + $0xf0] sm:$0xff] %v7847_v3  ;;  %56 = vst [vmem:[#allocation2 + $0xf8] sm:$0xff] %v7847_v3 }
  0x11   :  { %10 = vsyncpa [#allocation4], 0  ;;  %v5915_v24 = vpack.c.bf16 %v1684_v17, %v1681_v16  ;;  %v1687_v25 = vand.u32 4294901760, %v5897_v18  ;;  %v1690_v26 = vand.u32 4294901760, %v5902_v19  ;;  %v5922_v27 = vld [vmem:[%s7820_s4 + $0x30] sm:$0xff]  ;;  %v5927_v28 = vld [vmem:[%s7818_s2] sm:$0xff]  ;;  %5308 = vmatprep.subr.bf16.mxu1 %v5913_v23  ;;  %v5940_v33 = vsub.f32 %v1613_v10, %v1675_v12 }
  0x12   :  { %v5932_v29 = vld [vmem:[%s7818_s2 + $0x8] sm:$0xff]  ;;  %v5935_v30 = vsel %vm1670_vm0, %v1620_v20, 0  ;;  %v238_v31 = vand.u32 4294901760, %v5927_v28  ;;  %5310 = vmatpush3.bf16.msra.mxu1 %v5913_v23  ;;  %v5942_v34 = vsub.f32 %v1614_v11, %v1678_v15  ;;  %1545 = vperm.xlu1 %5763, %v1510_v21   ;;  %v1693_v35 = vand.u32 4294901760, %v5922_v27  ;;  %v1512_v37 = vld [vmem:[%s7819_s3 + $0x58] sm:$0xff]  ;;  %v1511_v38 = vld [vmem:[%s7819_s3 + $0x50] sm:$0xff] }
  0x13   :  { %v241_v32 = vand.u32 4294901760, %v5932_v29  ;;  %8033 = vst [vmem:[#allocation6_spill] sm:$0xff] %v5940_v33  ;;  %1542 = vperm.xlu0 %5762, %v1509_v22   ;;  %5312 = vmatprep.subr.bf16.mxu1 %v5915_v24  ;;  %v5962_v39 = vpack.c.bf16 %v1690_v26, %v1687_v25  ;;  %v1696_v40 = vand.u32 4294901760, %v5935_v30  ;;  %v7842_v41 = vand.u32 4294901760, %v5940_v33  ;;  %v5971_v43 = vld [vmem:[%s7818_s2 + $0x10] sm:$0xff]  ;;  %v5976_v44 = vld [vmem:[%s7818_s2 + $0x18] sm:$0xff] }
  0x14   :  { %8034 = vst [vmem:[#allocation7_spill] sm:$0xff] %v5942_v34  ;;  %v7841_v42 = vand.u32 4294901760, %v5942_v34  ;;  %v244_v47 = vand.u32 4294901760, %v5971_v43  ;;  %v247_v48 = vand.u32 4294901760, %v5976_v44  ;;  %v1514_v49 = vld [vmem:[%s7819_s3 + $0x68] sm:$0xff]  ;;  %v1513_v50 = vld [vmem:[%s7819_s3 + $0x60] sm:$0xff]  ;;  %v6019_v57 = vsub.f32 %v1615_v13, %v1681_v16 }
  0x15   :  { %v5949_v36 = vpack.c.bf16 %v241_v32, %v238_v31  ;;  %v1911_v45 = vsub.f32 %v5940_v33, %v7842_v41  ;;  %v5999_v51 = vpack.c.bf16 %v1696_v40, %v1693_v35  ;;  %v6010_v55 = vld [vmem:[%s7818_s2 + $0x20] sm:$0xff]  ;;  %v6015_v56 = vld [vmem:[%s7818_s2 + $0x28] sm:$0xff]  ;;  %v6021_v58 = vsub.f32 %v1616_v14, %v1684_v17  ;;  %v1516_v61 = vld [vmem:[%s7819_s3 + $0x78] sm:$0xff] }
  0x16   :  { %5314 = vmatpush3.bf16.msra.mxu1 %v5915_v24  ;;  %v1918_v46 = vsub.f32 %v5942_v34, %v7841_v42  ;;  %1551 = vperm.xlu1 %5763, %v1512_v37   ;;  %v6005_v54 = vpack.c.bf16 %v247_v48, %v244_v47  ;;  %8038 = vst [vmem:[#allocation11_spill] sm:$0xff] %v6019_v57  ;;  %v250_v59 = vand.u32 4294901760, %v6010_v55  ;;  %v253_v60 = vand.u32 4294901760, %v6015_v56  ;;  %v1515_v62 = vld [vmem:[%s7819_s3 + $0x70] sm:$0xff]  ;;  %v6051_v5 = vld [vmem:[%s7818_s2 + $0x38] sm:$0xff]  ;;  %v60_v10 = vld [vmem:[%s7817_s1 + $0x8] sm:$0xff] }
  0x17   :  { %8035 = vst [vmem:[#allocation8_spill] sm:$0xff] %v5949_v36  ;;  %5164 = vmatprep.subr.bf16.mxu0 %v5949_v36  ;;  %1548 = vperm.xlu0 %5762, %v1511_v38   ;;  %8036 = vst [vmem:[#allocation9_spill] sm:$0xff] %v5999_v51  ;;  %v1912_v52 = vand.u32 4294901760, %v1911_v45  ;;  %v7840_v0 = vand.u32 4294901760, %v6019_v57  ;;  %v7839_v1 = vand.u32 4294901760, %v6021_v58  ;;  %v6046_v4 = vld [vmem:[%s7818_s2 + $0x30] sm:$0xff]  ;;  %v6080_v15 = vsub.f32 %v5897_v18, %v1687_v25 }
  0x18   :  { %5166 = vmatpush3.bf16.msra.mxu0 %v5949_v36  ;;  %5316 = vmatprep.subr.bf16.mxu1 %v5962_v39  ;;  %v1919_v53 = vand.u32 4294901760, %v1918_v46  ;;  %8037 = vst [vmem:[#allocation10_spill] sm:$0xff] %v6005_v54  ;;  %8039 = vst [vmem:[#allocation12_spill] sm:$0xff] %v6021_v58  ;;  %v6041_v2 = vpack.c.bf16 %v253_v60, %v250_v59  ;;  %v256_v8 = vand.u32 4294901760, %v6046_v4  ;;  %v259_v9 = vand.u32 4294901760, %v6051_v5  ;;  %v59_v11 = vld [vmem:[%s7817_s1] sm:$0xff] }
  0x19   :  { %5168 = vmatprep.subr.bf16.mxu0 %v6005_v54  ;;  %v1925_v6 = vsub.f32 %v6019_v57, %v7840_v0  ;;  %v1932_v7 = vsub.f32 %v6021_v58, %v7839_v1  ;;  %8042 = vst [vmem:[#allocation15_spill] sm:$0xff] %v6080_v15  ;;  %v6085_v16 = vsub.f32 %v5902_v19, %v1690_v26  ;;  %v6090_v17 = vld [vmem:[%s7818_s2 + $0x40] sm:$0xff]  ;;  %v6095_v20 = vld [vmem:[%s7818_s2 + $0x48] sm:$0xff]  ;;  %v7837_v19 = vand.u32 4294901760, %v6080_v15  ;;  %v62_v26 = vld [vmem:[%s7817_s1 + $0x18] sm:$0xff] }
  0x1a   :  { %5318 = vmatpush3.bf16.msra.mxu1 %v5962_v39  ;;  %1557 = vperm.xlu1 %5763, %v1514_v49   ;;  %v6032_v63 = vpack.c.bf16 %v1919_v53, %v1912_v52  ;;  %8040 = vst [vmem:[#allocation13_spill] sm:$0xff] %v6041_v2  ;;  %v6074_v14 = vpack.c.bf16 %v259_v9, %v256_v8  ;;  %v262_v18 = vand.u32 4294901760, %v6090_v17  ;;  %v265_v22 = vand.u32 4294901760, %v6095_v20  ;;  %v61_v37 = vld [vmem:[%s7817_s1 + $0x10] sm:$0xff] }
  0x1b   :  { %1554 = vperm.xlu0 %5762, %v1513_v50   ;;  %5320 = vmatprep.subr.bf16.mxu1 %v5999_v51  ;;  %v1926_v12 = vand.u32 4294901760, %v1925_v6  ;;  %v1933_v13 = vand.u32 4294901760, %v1932_v7  ;;  %8043 = vst [vmem:[#allocation16_spill] sm:$0xff] %v6085_v16  ;;  %v7836_v25 = vand.u32 4294901760, %v6085_v16  ;;  %v1939_v45 = vsub.f32 %v6080_v15, %v7837_v19  ;;  %v6126_v49 = vld [vmem:[%s7818_s2 + $0x50] sm:$0xff]  ;;  %v6131_v50 = vld [vmem:[%s7818_s2 + $0x58] sm:$0xff] }
  0x1c   :  { %5170 = vmatpush3.bf16.msra.mxu0 %v6005_v54  ;;  %8041 = vst [vmem:[#allocation14_spill] sm:$0xff] %v6074_v14  ;;  %v6114_v38 = vpack.c.bf16 %v265_v22, %v262_v18  ;;  %v6136_v52 = vsub.f32 %v5922_v27, %v1693_v35  ;;  %v6141_v53 = vsub.f32 %v5935_v30, %v1696_v40  ;;  %v64_v35 = vld [vmem:[%s7817_s1 + $0x28] sm:$0xff]  ;;  %v63_v30 = vld [vmem:[%s7817_s1 + $0x20] sm:$0xff]  ;;  %vm233_vm1 = vcmask 1043456  }
  0x1d   :  { %5172 = vmatprep.subr.bf16.mxu0 %v6041_v2  ;;  %v6097_v21 = vpack.c.bf16 %v1933_v13, %v1926_v12  ;;  %v1946_v46 = vsub.f32 %v6085_v16, %v7836_v25  ;;  %v1940_v6 = vand.u32 4294901760, %v1939_v45  ;;  %vm1621_vm2 = vcmask 465920  }
  0x1e   :  { %5322 = vmatpush3.bf16.msra.mxu1 %v5999_v51  ;;  %1563 = vperm.xlu1 %5763, %v1516_v61   ;;  %8044 = vst [vmem:[#allocation17_spill] sm:$0xff] %v6114_v38  ;;  %8045 = vst [vmem:[#allocation18_spill] sm:$0xff] %v6136_v52  ;;  %v268_v61 = vand.u32 4294901760, %v6126_v49  ;;  %v7822_v27 = vand.u32 4294901760, %v6141_v53 }
  0x1f   :  { %1560 = vperm.xlu0 %5762, %v1515_v62   ;;  %5324 = vmatprep.subr.bf16.mxu1 %v6032_v63  ;;  %8046 = vst [vmem:[#allocation19_spill] sm:$0xff] %v6141_v53  ;;  %v271_v62 = vand.u32 4294901760, %v6131_v50  ;;  %v1947_v7 = vand.u32 4294901760, %v1946_v46 }
  0x20   :  { %5174 = vmatpush3.bf16.msra.mxu0 %v6041_v2  ;;  %v1960_v13 = vsub.f32 %v6141_v53, %v7822_v27 }
  0x21   :  { %5176 = vmatprep.subr.bf16.mxu0 %v6074_v14  ;;  %v6158_v40 = vpack.c.bf16 %v271_v62, %v268_v61 }
  0x22   :  { %79 = vperm.xlu1 %5763, %v60_v10   ;;  %v7828_v10 = vand.u32 4294901760, %v6136_v52  ;;  %v1961_v45 = vand.u32 4294901760, %v1960_v13 }
  0x23   :  { %76 = vperm.xlu0 %5762, %v59_v11   ;;  %8047 = vst [vmem:[#allocation20_spill] sm:$0xff] %v6158_v40  ;;  %v6160_v11 = vpack.c.bf16 %v1947_v7, %v1940_v6  ;;  %v66_v6 = vld [vmem:[%s7817_s1 + $0x38] sm:$0xff]  ;;  %v65_v7 = vld [vmem:[%s7817_s1 + $0x30] sm:$0xff] }
  0x24   :  { %5178 = vmatpush3.bf16.msra.mxu0 %v6074_v14  ;;  %v1953_v12 = vsub.f32 %v6136_v52, %v7828_v10 }
  0x25   :  { %5180 = vmatprep.subr.bf16.mxu0 %v6114_v38 }
  0x26   :  { %85 = vperm.xlu1 %5763, %v62_v26   ;;  %v183_v26 = vld [vmem:[%s7818_s2 + $0x60] sm:$0xf] }
  0x27   :  { %82 = vperm.xlu0 %5762, %v61_v37   ;;  %v1954_v37 = vand.u32 4294901760, %v1953_v12  ;;  %v6173_v46 = vsel %vm233_vm1, %v183_v26, 0 }
  0x28   :  { %5182 = vmatpush3.bf16.msra.mxu0 %v6114_v38  ;;  %v6182_v27 = vand.u32 4294901760, %v6173_v46 }
  0x29   :  { %5184 = vmatprep.subr.bf16.mxu0 %v6158_v40  ;;  %v6194_v12 = vpack.c.bf16 %v1961_v45, %v1954_v37  ;;  %v6215_v37 = vsub.f32 %v5971_v43, %v244_v47  ;;  %v6220_v45 = vsub.f32 %v5976_v44, %v247_v48  ;;  %v70_v47 = vld [vmem:[%s7817_s1 + $0x58] sm:$0xff]  ;;  %v69_v44 = vld [vmem:[%s7817_s1 + $0x50] sm:$0xff] }
  0x2a   :  { %91 = vperm.xlu1 %5763, %v64_v35   ;;  %8048 = vst [vmem:[#allocation21_spill] sm:$0xff] %v6182_v27  ;;  %v6187_v35 = vsub.f32 %v5927_v28, %v238_v31  ;;  %v68_v28 = vld [vmem:[%s7817_s1 + $0x48] sm:$0xff] }
  0x2b   :  { %88 = vperm.xlu0 %5762, %v63_v30   ;;  %v6192_v30 = vsub.f32 %v5932_v29, %v241_v32  ;;  %v67_v29 = vld [vmem:[%s7817_s1 + $0x40] sm:$0xff]  ;;  %8051 = vst [vmem:[#allocation24_spill] sm:$0xff] %v6215_v37  ;;  %8052 = vst [vmem:[#allocation25_spill] sm:$0xff] %v6220_v45  ;;  %v7826_v43 = vand.u32 4294901760, %v6220_v45 }
  0x2c   :  { %8049 = vst [vmem:[#allocation22_spill] sm:$0xff] %v6187_v35  ;;  %5186 = vmatpush3.bf16.msra.mxu0 %v6158_v40  ;;  %v7823_v13 = vand.u32 4294901760, %v6187_v35 }
  0x2d   :  { %8050 = vst [vmem:[#allocation23_spill] sm:$0xff] %v6192_v30  ;;  %4647 = vmatprep.subr.mxu0 %v6182_v27  ;;  %v7824_v26 = vand.u32 4294901760, %v6192_v30 }
  0x2e   :  { %97 = vperm.xlu1 %5763, %v66_v6   ;;  %v479_v31 = vsub.f32 %v6187_v35, %v7823_v13  ;;  %v6225_v6 = vpack.c.bf16 %v5942_v34, %v5940_v33 }
  0x2f   :  { %94 = vperm.xlu0 %5762, %v65_v7   ;;  %v486_v32 = vsub.f32 %v6192_v30, %v7824_v26  ;;  %v7825_v26 = vand.u32 4294901760, %v6215_v37 }
  0x30   :  { %4648 = vmatpush3.msra.mxu0 %v6182_v27  ;;  %v480_v7 = vand.u32 4294901760, %v479_v31 }
  0x31   :  { %v487_v13 = vand.u32 4294901760, %v486_v32  ;;  %v493_v31 = vsub.f32 %v6215_v37, %v7825_v26  ;;  %v500_v32 = vsub.f32 %v6220_v45, %v7826_v43  ;;  %v6282_v43 = vpack.c.bf16 %v6021_v58, %v6019_v57 }
  0x32   :  { %103 = vperm.xlu1 %5763, %v68_v28   ;;  %v6243_v28 = vsub.f32 %v6010_v55, %v250_v59  ;;  %v72_v59 = vld [vmem:[%s7817_s1 + $0x68] sm:$0xff] }
  0x33   :  { %100 = vperm.xlu0 %5762, %v67_v29   ;;  %v6235_v48 = vpack.c.bf16 %v487_v13, %v480_v7  ;;  %v6248_v29 = vsub.f32 %v6015_v56, %v253_v60  ;;  %v494_v13 = vand.u32 4294901760, %v493_v31  ;;  %v501_v55 = vand.u32 4294901760, %v500_v32  ;;  %v71_v56 = vld [vmem:[%s7817_s1 + $0x60] sm:$0xff] }
  0x34   :  { %8053 = vst [vmem:[#allocation26_spill] sm:$0xff] %v6243_v28  ;;  %v7827_v7 = vand.u32 4294901760, %v6243_v28 }
  0x35   :  { %8054 = vst [vmem:[#allocation27_spill] sm:$0xff] %v6248_v29  ;;  %5188 = vmatprep.subr.bf16.mxu0 %v6235_v48  ;;  %v7829_v26 = vand.u32 4294901760, %v6248_v29  ;;  %v6278_v32 = vpack.c.bf16 %v501_v55, %v494_v13  ;;  %v6300_v55 = vsub.f32 %v6090_v17, %v262_v18  ;;  %v6321_v18 = vsub.f32 %v6126_v49, %v268_v61 }
  0x36   :  { %109 = vperm.xlu1 %5763, %v70_v47   ;;  %v507_v60 = vsub.f32 %v6243_v28, %v7827_v7  ;;  %v6271_v47 = vsub.f32 %v6046_v4, %v256_v8  ;;  %v74_v8 = vld [vmem:[%s7817_s1 + $0x78] sm:$0xff] }
  0x37   :  { %106 = vperm.xlu0 %5762, %v69_v44   ;;  %v514_v31 = vsub.f32 %v6248_v29, %v7829_v26  ;;  %v6276_v44 = vsub.f32 %v6051_v5, %v259_v9  ;;  %v73_v5 = vld [vmem:[%s7817_s1 + $0x70] sm:$0xff]  ;;  %8057 = vst [vmem:[#allocation30_spill] sm:$0xff] %v6300_v55  ;;  %8059 = vst [vmem:[#allocation32_spill] sm:$0xff] %v6321_v18  ;;  %s5791_s1 = smov 16  }
  0x38   :  { %8055 = vst [vmem:[#allocation28_spill] sm:$0xff] %v6271_v47  ;;  %v508_v7 = vand.u32 4294901760, %v507_v60  ;;  %v7835_v26 = vand.u32 4294901760, %v6271_v47 }
  0x39   :  { %8056 = vst [vmem:[#allocation29_spill] sm:$0xff] %v6276_v44  ;;  %v515_v10 = vand.u32 4294901760, %v514_v31  ;;  %v7832_v4 = vand.u32 4294901760, %v6276_v44 }
  0x3a   :  { %115 = vperm.xlu1 %5763, %v72_v59   ;;  %v521_v13 = vsub.f32 %v6271_v47, %v7835_v26  ;;  %v6305_v59 = vsub.f32 %v6095_v20, %v265_v22  ;;  %v6326_v22 = vsub.f32 %v6131_v50, %v271_v62 }
  0x3b   :  { %112 = vperm.xlu0 %5762, %v71_v56   ;;  %v6292_v9 = vpack.c.bf16 %v515_v10, %v508_v7  ;;  %v528_v56 = vsub.f32 %v6276_v44, %v7832_v4  ;;  %v7831_v7 = vand.u32 4294901760, %v6300_v55 }
  0x3c   :  { %8058 = vst [vmem:[#allocation31_spill] sm:$0xff] %v6305_v59  ;;  %v522_v10 = vand.u32 4294901760, %v521_v13  ;;  %v7830_v60 = vand.u32 4294901760, %v6305_v59  ;;  %8060 = vst [vmem:[#allocation33_spill] sm:$0xff] %v6326_v22 }
  0x3d   :  { %v529_v31 = vand.u32 4294901760, %v528_v56  ;;  %v535_v17 = vsub.f32 %v6300_v55, %v7831_v7  ;;  %v7833_v7 = vand.u32 4294901760, %v6326_v22 }
  0x3e   :  { %121 = vperm.xlu1 %5763, %v74_v8   ;;  %v542_v20 = vsub.f32 %v6305_v59, %v7830_v60  ;;  %v7834_v60 = vand.u32 4294901760, %v6321_v18 }
  0x3f   :  { %118 = vperm.xlu0 %5762, %v73_v5   ;;  %v6328_v8 = vpack.c.bf16 %v529_v31, %v522_v10  ;;  %v6332_v5 = vpack.c.bf16 %v6085_v16, %v6080_v15  ;;  %v536_v13 = vand.u32 4294901760, %v535_v17  ;;  %v556_v50 = vsub.f32 %v6326_v22, %v7833_v7 }
  0x40   :  { %v543_v56 = vand.u32 4294901760, %v542_v20  ;;  %v549_v49 = vsub.f32 %v6321_v18, %v7834_v60  ;;  %v6346_v10 = vpack.c.bf16 %v6141_v53, %v6136_v52  ;;  %v6352_v17 = vpack.c.bf16 %v6192_v30, %v6187_v35 }
  0x41   :  { %v557_v62 = vand.u32 4294901760, %v556_v50  ;;  %v6356_v20 = vpack.c.bf16 %v6220_v45, %v6215_v37  ;;  %v6372_v50 = vpack.c.bf16 %v6326_v22, %v6321_v18 }
  0x42   :  { %v6336_v4 = vpack.c.bf16 %v543_v56, %v536_v13  ;;  %v550_v61 = vand.u32 4294901760, %v549_v49  ;;  %v6360_v13 = vpack.c.bf16 %v6248_v29, %v6243_v28  ;;  %v6364_v56 = vpack.c.bf16 %v6276_v44, %v6271_v47 }
  0x43   :  { %v6368_v49 = vpack.c.bf16 %v6305_v59, %v6300_v55  ;;  %8062 = vst [vmem:[#allocation35_spill] sm:$0xff] %v6372_v50  ;;  %v8067_v44 = vmov 0.0  }
  0x44   :  { %v6348_v31 = vpack.c.bf16 %v557_v62, %v550_v61  ;;  %v7838_v61 = vlaneseq }
  0x45   :  { %8061 = vst [vmem:[#allocation34_spill] sm:$0xff] %v6368_v49 }
  0x46   :  { %v6375_v62 = vand.u32 127, %v7838_v61 }
  0x81   :  { %v1525_v7 = vpop.permute.xlu1 %1524  ;;  %v1519_v60 = vpop.permute.xlu0 %1518 }
  0x82   :  { %vm1567_vm3 = vcmp.eq.s32.totalorder %v1525_v7, %v6375_v62  ;;  %vm1565_vm4 = vcmp.eq.s32.totalorder %v1519_v60, %v6375_v62 }
  0x83   :  { %v6380_v26 = vsel %vm1567_vm3, 1.0, %v7847_v3  ;;  %v6383_v25 = vsel %vm1565_vm4, 1.0, %v7847_v3  ;;  %vm184_vm4 = vcmask 818176  }
  0x84   :  { %8063 = vst [vmem:[#allocation36_spill] sm:$0xff] %v6380_v26  ;;  %8064 = vst [vmem:[#allocation37_spill] sm:$0xff] %v6383_v25  ;;  %v1629_v19 = vsel %vm1621_vm2, %v6380_v26, 0  ;;  %v1623_v61 = vsel %vm1621_vm2, %v6383_v25, 0 }
  0x85   :  { %v6389_v1 = vsub.f32 %v1629_v19, %v1629_v19  ;;  %v1528_v0 = vpop.permute.xlu1 %1527  ;;  %v1522_v42 = vpop.permute.xlu0 %1521  ;;  %v6391_v41 = vsub.f32 %v1623_v61, %v1623_v61 }
  0x86   :  { %vm1568_vm5 = vcmp.eq.s32.totalorder %v1528_v0, %v6375_v62  ;;  %vm1566_vm6 = vcmp.eq.s32.totalorder %v1522_v42, %v6375_v62 }
  0x87   :  { %v6396_v7 = vsel %vm1568_vm5, 1.0, %v7847_v3  ;;  %v6399_v60 = vsel %vm1566_vm6, 1.0, %v7847_v3  ;;  %v7853_v22 = vand.u32 4294901760, %v6391_v41 }
  0x88   :  { %8065 = vst [vmem:[#allocation38_spill] sm:$0xff] %v6396_v7  ;;  %8066 = vst [vmem:[#allocation39_spill] sm:$0xff] %v6399_v60  ;;  %v1632_v19 = vsel %vm1621_vm2, %v6396_v7, 0  ;;  %v1626_v18 = vsel %vm1621_vm2, %v6399_v60, 0 }
  0x89   :  { %v6407_v59 = vsub.f32 %v1632_v19, %v1632_v19  ;;  %v6409_v0 = vsub.f32 %v1626_v18, %v1626_v18  ;;  %v1534_v42 = vpop.permute.xlu1 %1533  ;;  %v1531_v55 = vpop.permute.xlu0 %1530  ;;  %v1750_v3 = vsub.f32 %v6391_v41, %v7853_v22  ;;  %v8070_v22 = vand.u32 4294901760, %v6389_v1 }
  0x8a   :  { %vm1570_vm7 = vcmp.eq.s32.totalorder %v1534_v42, %v6375_v62  ;;  %vm1569_vm8 = vcmp.eq.s32.totalorder %v1531_v55, %v6375_v62 }
  0x8b   :  { %v6417_v47 = vsel %vm1570_vm7, 1.0, %v8067_v44  ;;  %v6420_v29 = vsel %vm1569_vm8, 1.0, %v8067_v44  ;;  %v1751_v19 = vand.u32 4294901760, %v1750_v3  ;;  %v7860_v18 = vand.u32 4294901760, %v6409_v0 }
  0x8c   :  { %8068 = vst [vmem:[#allocation40_spill] sm:$0xff] %v6417_v47  ;;  %8069 = vst [vmem:[#allocation41_spill] sm:$0xff] %v6420_v29  ;;  %v1638_v61 = vsel %vm1621_vm2, %v6417_v47, 0  ;;  %v1635_v28 = vsel %vm1621_vm2, %v6420_v29, 0  ;;  %v1770_v42 = vsub.f32 %v6389_v1, %v8070_v22  ;;  %v7865_v55 = vand.u32 4294901760, %v6407_v59 }
  0x8d   :  { %v6431_v45 = vsub.f32 %v1638_v61, %v1638_v61  ;;  %v6433_v37 = vsub.f32 %v1635_v28, %v1635_v28  ;;  %v1540_v30 = vpop.permute.xlu1 %1539  ;;  %v1537_v3 = vpop.permute.xlu0 %1536  ;;  %4939 = vmatprep.mubr.f32.mxu1 %v1751_v19  ;;  %v1760_v35 = vsub.f32 %v6409_v0, %v7860_v18 }
  0x8e   :  { %vm1572_vm9 = vcmp.eq.s32.totalorder %v1540_v30, %v6375_v62  ;;  %vm1571_vm10 = vcmp.eq.s32.totalorder %v1537_v3, %v6375_v62  ;;  %v1780_v22 = vsub.f32 %v6407_v59, %v7865_v55  ;;  %v1771_v3 = vand.u32 4294901760, %v1770_v42 }
  0x8f   :  { %v6444_v61 = vsel %vm1572_vm9, 1.0, %v8067_v44  ;;  %v6447_v28 = vsel %vm1571_vm10, 1.0, %v8067_v44  ;;  %v1761_v40 = vand.u32 4294901760, %v1760_v35  ;;  %v7871_v19 = vand.u32 4294901760, %v6433_v37 }
  0x90   :  { %8071 = vst [vmem:[#allocation42_spill] sm:$0xff] %v6447_v28  ;;  %v1644_v18 = vsel %vm1621_vm2, %v6444_v61, 0  ;;  %v1641_v30 = vsel %vm1621_vm2, %v6447_v28, 0  ;;  %v7870_v38 = vand.u32 4294901760, %v6431_v45  ;;  %v1781_v42 = vand.u32 4294901760, %v1780_v22 }
  0x91   :  { %v6455_v14 = vsub.f32 %v1644_v18, %v1644_v18  ;;  %v6457_v55 = vsub.f32 %v1641_v30, %v1641_v30  ;;  %v1546_v53 = vpop.permute.xlu1 %1545  ;;  %4940 = vmatmul.mubr.f32.vlgmr.msra.gmra.mrb[0].mxu1 %v1761_v40  ;;  %v1790_v35 = vsub.f32 %v6433_v37, %v7871_v19 }
  0x92   :  { %v1543_v52 = vpop.permute.xlu0 %1542  ;;  %vm1574_vm11 = vcmp.eq.s32.totalorder %v1546_v53, %v6375_v62  ;;  %5326 = vmatpush3.bf16.msra.mxu1 %v6032_v63  ;;  %4942 = vmatprep.mubr.f32.mxu1 %v1771_v3  ;;  %v1800_v18 = vsub.f32 %v6431_v45, %v7870_v38 }
  0x93   :  { %8072 = vst [vmem:[#allocation43_spill] sm:$0xff] %v6455_v14  ;;  %8073 = vst [vmem:[#allocation44_spill] sm:$0xff] %v6457_v55  ;;  %vm1573_vm12 = vcmp.eq.s32.totalorder %v1543_v52, %v6375_v62  ;;  %v6469_v30 = vsel %vm1574_vm11, 1.0, %v8067_v44  ;;  %v1791_v2 = vand.u32 4294901760, %v1790_v35  ;;  %5328 = vmatprep.subr.bf16.mxu1 %v6097_v21  ;;  %v7875_v53 = vand.u32 4294901760, %v6457_v55 }
  0x94   :  { %v6472_v40 = vsel %vm1573_vm12, 1.0, %v8067_v44  ;;  %v1650_v63 = vsel %vm1621_vm2, %v6469_v30, 0  ;;  %v7876_v22 = vand.u32 4294901760, %v6455_v14  ;;  %v1801_v15 = vand.u32 4294901760, %v1800_v18 }
  0x95   :  { %v1647_v52 = vsel %vm1621_vm2, %v6472_v40, 0  ;;  %v6481_v3 = vsub.f32 %v1650_v63, %v1650_v63  ;;  %v1552_v19 = vpop.permute.xlu1 %1551  ;;  %4943 = vmatmul.mubr.f32.gmra.mrb[2].mxu1 %v1781_v42  ;;  %v1810_v35 = vsub.f32 %v6457_v55, %v7875_v53 }
  0x96   :  { %v6483_v38 = vsub.f32 %v1647_v52, %v1647_v52  ;;  %v1549_v16 = vpop.permute.xlu0 %1548  ;;  %vm1576_vm13 = vcmp.eq.s32.totalorder %v1552_v19, %v6375_v62  ;;  %4945 = vmatprep.mubr.f32.mxu1 %v1791_v2  ;;  %5330 = vmatpush3.bf16.msra.mxu1 %v6097_v21  ;;  %v1820_v63 = vsub.f32 %v6455_v14, %v7876_v22 }
  0x97   :  { %8074 = vst [vmem:[#allocation45_spill] sm:$0xff] %v6481_v3  ;;  %vm1575_vm14 = vcmp.eq.s32.totalorder %v1549_v16, %v6375_v62  ;;  %v6495_v52 = vsel %vm1576_vm13, 1.0, %v8067_v44  ;;  %v1811_v58 = vand.u32 4294901760, %v1810_v35  ;;  %5332 = vmatprep.subr.bf16.mxu1 %v6160_v11  ;;  %v7883_v21 = vand.u32 4294901760, %v6481_v3 }
  0x98   :  { %8075 = vst [vmem:[#allocation46_spill] sm:$0xff] %v6483_v38  ;;  %v6498_v42 = vsel %vm1575_vm14, 1.0, %v8067_v44  ;;  %v7882_v53 = vand.u32 4294901760, %v6483_v38  ;;  %v1656_v2 = vsel %vm1621_vm2, %v6495_v52, 0  ;;  %v1821_v54 = vand.u32 4294901760, %v1820_v63 }
  0x99   :  { %v1653_v16 = vsel %vm1621_vm2, %v6498_v42, 0  ;;  %v6507_v19 = vsub.f32 %v1656_v2, %v1656_v2  ;;  %v1558_v22 = vpop.permute.xlu1 %1557  ;;  %4946 = vmatmul.mubr.f32.gmra.mrb[4].mxu1 %v1801_v15  ;;  %v1840_v2 = vsub.f32 %v6481_v3, %v7883_v21 }
  0x9a   :  { %v6509_v18 = vsub.f32 %v1653_v16, %v1653_v16  ;;  %v1555_v57 = vpop.permute.xlu0 %1554  ;;  %v1830_v35 = vsub.f32 %v6483_v38, %v7882_v53  ;;  %vm1578_vm15 = vcmp.eq.s32.totalorder %v1558_v22, %v6375_v62  ;;  %4948 = vmatprep.mubr.f32.mxu1 %v1811_v58  ;;  %5334 = vmatpush3.bf16.msra.mxu1 %v6160_v11 }
  0x9b   :  { %8076 = vst [vmem:[#allocation47_spill] sm:$0xff] %v6507_v19  ;;  %vm1577_vm0 = vcmp.eq.s32.totalorder %v1555_v57, %v6375_v62  ;;  %v6521_v16 = vsel %vm1578_vm15, 1.0, %v8067_v44  ;;  %5336 = vmatprep.subr.bf16.mxu1 %v6194_v12  ;;  %v7890_v22 = vand.u32 4294901760, %v6507_v19  ;;  %v1841_v3 = vand.u32 4294901760, %v1840_v2 }
  0x9c   :  { %8077 = vst [vmem:[#allocation48_spill] sm:$0xff] %v6509_v18  ;;  %v6524_v15 = vsel %vm1577_vm0, 1.0, %v8067_v44  ;;  %v1831_v36 = vand.u32 4294901760, %v1830_v35  ;;  %v7889_v53 = vand.u32 4294901760, %v6509_v18  ;;  %v1662_v57 = vsel %vm1621_vm2, %v6521_v16, 0 }
  0x9d   :  { %v1659_v58 = vsel %vm1621_vm2, %v6524_v15, 0  ;;  %v6533_v11 = vsub.f32 %v1662_v57, %v1662_v57  ;;  %v1564_v21 = vpop.permute.xlu1 %1563  ;;  %4949 = vmatmul.mubr.f32.gmra.mrb[6].mxu1 %v1821_v54  ;;  %v1860_v57 = vsub.f32 %v6507_v19, %v7890_v22 }
  0x9e   :  { %v6535_v63 = vsub.f32 %v1659_v58, %v1659_v58  ;;  %v1561_v50 = vpop.permute.xlu0 %1560  ;;  %v1850_v35 = vsub.f32 %v6509_v18, %v7889_v53  ;;  %vm1580_vm1 = vcmp.eq.s32.totalorder %v1564_v21, %v6375_v62  ;;  %4951 = vmatprep.mubr.f32.mxu1 %v1831_v36  ;;  %5338 = vmatpush3.bf16.msra.mxu1 %v6194_v12 }
  0x9f   :  { %8078 = vst [vmem:[#allocation49_spill] sm:$0xff] %v6533_v11  ;;  %vm1579_vm3 = vcmp.eq.s32.totalorder %v1561_v50, %v6375_v62  ;;  %v6547_v58 = vsel %vm1580_vm1, 1.0, %v8067_v44  ;;  %5340 = vmatprep.subr.bf16.mxu1 %v6225_v6  ;;  %v7897_v12 = vand.u32 4294901760, %v6533_v11  ;;  %v6568_v18 = vsub.f32 %v6173_v46, %v6182_v27 }
  0xa0   :  { %8079 = vst [vmem:[#allocation50_spill] sm:$0xff] %v6535_v63  ;;  %v6550_v54 = vsel %vm1579_vm3, 1.0, %v8067_v44  ;;  %v1851_v38 = vand.u32 4294901760, %v1850_v35  ;;  %v7896_v53 = vand.u32 4294901760, %v6535_v63  ;;  %v1668_v36 = vsel %vm1621_vm2, %v6547_v58, 0 }
  0xa1   :  { %v1665_v50 = vsel %vm1621_vm2, %v6550_v54, 0  ;;  %v6559_v21 = vsub.f32 %v1668_v36, %v1668_v36  ;;  %v80_v22 = vpop.permute.xlu1 %79  ;;  %4952 = vmatmul.mubr.f32.gmra.mrb[8].mxu1 %v1841_v3  ;;  %v1861_v36 = vand.u32 4294901760, %v1860_v57 }
  0xa2   :  { %v6561_v2 = vsub.f32 %v1665_v50, %v1665_v50  ;;  %v77_v19 = vpop.permute.xlu0 %76  ;;  %v1870_v35 = vsub.f32 %v6535_v63, %v7896_v53  ;;  %vm124_vm5 = vcmp.eq.s32.totalorder %v80_v22, %v6375_v62  ;;  %4954 = vmatprep.mubr.f32.mxu1 %v1851_v38  ;;  %v1880_v50 = vsub.f32 %v6533_v11, %v7897_v12 }
  0xa3   :  { %8080 = vst [vmem:[#allocation51_spill] sm:$0xff] %v6559_v21  ;;  %vm123_vm6 = vcmp.eq.s32.totalorder %v77_v19, %v6375_v62  ;;  %v6576_v3 = vsel %vm124_vm5, 1.0, %v8067_v44  ;;  %v6595_v63 = vand.u32 4294901760, %v6568_v18 }
  0xa4   :  { %8081 = vst [vmem:[#allocation52_spill] sm:$0xff] %v6561_v2  ;;  %v6579_v49 = vsel %vm123_vm6, 1.0, %v8067_v44  ;;  %v1871_v53 = vand.u32 4294901760, %v1870_v35  ;;  %v7906_v46 = vand.u32 4294901760, %v6561_v2  ;;  %v189_v22 = vsel %vm184_vm4, %v6576_v3, 0 }
  0xa5   :  { %v186_v38 = vsel %vm184_vm4, %v6579_v49, 0  ;;  %v6587_v57 = vsub.f32 %v189_v22, %v189_v22  ;;  %v86_v12 = vpop.permute.xlu1 %85  ;;  %4955 = vmatmul.mubr.f32.gmra.mrb[10].mxu1 %v1861_v36  ;;  %v1881_v19 = vand.u32 4294901760, %v1880_v50  ;;  %v8084_v22 = vand.u32 4294901760, %v6559_v21 }
  0xa6   :  { %v83_v27 = vpop.permute.xlu0 %82  ;;  %v1890_v11 = vsub.f32 %v6561_v2, %v7906_v46  ;;  %v6592_v35 = vsub.f32 %v186_v38, %v186_v38  ;;  %vm126_vm7 = vcmp.eq.s32.totalorder %v86_v12, %v6375_v62  ;;  %4957 = vmatprep.mubr.f32.mxu1 %v1871_v53 }
  0xa7   :  { %8082 = vst [vmem:[#allocation53_spill] sm:$0xff] %v6587_v57  ;;  %vm125_vm8 = vcmp.eq.s32.totalorder %v83_v27, %v6375_v62  ;;  %v1900_v14 = vsub.f32 %v6559_v21, %v8084_v22  ;;  %v6603_v36 = vsel %vm126_vm7, 1.0, %v8067_v44  ;;  %vm1484_vm7 = vcmask 130048  }
  0xa8   :  { %8083 = vst [vmem:[#allocation54_spill] sm:$0xff] %v6592_v35  ;;  %v6606_v46 = vsel %vm125_vm8, 1.0, %v8067_v44  ;;  %v1891_v38 = vand.u32 4294901760, %v1890_v11  ;;  %v7915_v2 = vand.u32 4294901760, %v6592_v35  ;;  %v195_v12 = vsel %vm184_vm4, %v6603_v36, 0 }
  0xa9   :  { %v192_v27 = vsel %vm184_vm4, %v6606_v46, 0  ;;  %v6614_v50 = vsub.f32 %v195_v12, %v195_v12  ;;  %v92_v21 = vpop.permute.xlu1 %91  ;;  %4958 = vmatmul.mubr.f32.gmra.mrb[12].mxu1 %v1881_v19  ;;  %v1901_v53 = vand.u32 4294901760, %v1900_v14  ;;  %v8086_v12 = vand.u32 4294901760, %v6587_v57 }
  0xaa   :  { %v6616_v22 = vsub.f32 %v192_v27, %v192_v27  ;;  %v89_v34 = vpop.permute.xlu0 %88  ;;  %v318_v11 = vsub.f32 %v6592_v35, %v7915_v2  ;;  %vm128_vm9 = vcmp.eq.s32.totalorder %v92_v21, %v6375_v62  ;;  %4960 = vmatprep.mubr.f32.mxu1 %v1891_v38 }
  0xab   :  { %8085 = vst [vmem:[#allocation55_spill] sm:$0xff] %v6614_v50  ;;  %vm127_vm10 = vcmp.eq.s32.totalorder %v89_v34, %v6375_v62  ;;  %v328_v27 = vsub.f32 %v6587_v57, %v8086_v12  ;;  %v6629_v51 = vsel %vm128_vm9, 1.0, %v8067_v44  ;;  %v7922_v38 = vand.u32 4294901760, %v6614_v50 }
  0xac   :  { %v6632_v19 = vsel %vm127_vm10, 1.0, %v8067_v44  ;;  %v319_v2 = vand.u32 4294901760, %v318_v11  ;;  %v7923_v35 = vand.u32 4294901760, %v6616_v22  ;;  %v201_v21 = vsel %vm184_vm4, %v6629_v51, 0 }
  0xad   :  { %v198_v34 = vsel %vm184_vm4, %v6632_v19, 0  ;;  %v329_v14 = vand.u32 4294901760, %v328_v27  ;;  %v6640_v33 = vsub.f32 %v201_v21, %v201_v21  ;;  %v98_v57 = vpop.permute.xlu1 %97  ;;  %4961 = vmatmul.mubr.f32.gmra.mrb[14].mxu1 %v1901_v53  ;;  %v348_v27 = vsub.f32 %v6614_v50, %v7922_v38 }
  0xae   :  { %v6642_v12 = vsub.f32 %v198_v34, %v198_v34  ;;  %v95_v55 = vpop.permute.xlu0 %94  ;;  %4649 = vmatprep.mubr.f32.mxu0 %v319_v2  ;;  %v338_v11 = vsub.f32 %v6616_v22, %v7923_v35  ;;  %vm130_vm11 = vcmp.eq.s32.totalorder %v98_v57, %v6375_v62  ;;  %4979 = vmatprep.mubr.msk.f32.mxu1 %vm1621_vm2, %v6383_v25  ;;  %vm2920_vm10 = vcmask 195712  }
  0xaf   :  { %vm129_vm12 = vcmp.eq.s32.totalorder %v95_v55, %v6375_v62  ;;  %4650 = vmatmul.mubr.f32.vlgmr.msra.gmra.mrb[0].mxu0 %v329_v14  ;;  %v6655_v21 = vsel %vm130_vm11, 1.0, %v8067_v44  ;;  %v349_v14 = vand.u32 4294901760, %v348_v27  ;;  %v7928_v38 = vand.u32 4294901760, %v6640_v33 }
  0xb0   :  { %8087 = vst [vmem:[#allocation56_spill] sm:$0xff] %v6655_v21  ;;  %v6658_v2 = vsel %vm129_vm12, 1.0, %v8067_v44  ;;  %v339_v53 = vand.u32 4294901760, %v338_v11  ;;  %v7929_v34 = vand.u32 4294901760, %v6642_v12  ;;  %5190 = vmatpush3.bf16.msra.mxu0 %v6235_v48  ;;  %v207_v55 = vsel %vm184_vm4, %v6655_v21, 0 }
  0xb1   :  { %8088 = vst [vmem:[#allocation57_spill] sm:$0xff] %v6658_v2  ;;  %v204_v57 = vsel %vm184_vm4, %v6658_v2, 0  ;;  %5192 = vmatprep.subr.bf16.mxu0 %v6278_v32  ;;  %v6668_v35 = vsub.f32 %v207_v55, %v207_v55  ;;  %v104_v11 = vpop.permute.xlu1 %103  ;;  %4980 = vmatmul.mubr.msk.f32.vlgmr.msra.gmra.mrb[0].mxu1 %vm1621_vm2, %v6399_v60  ;;  %v368_v27 = vsub.f32 %v6640_v33, %v7928_v38 }
  0xb2   :  { %v6670_v25 = vsub.f32 %v204_v57, %v204_v57  ;;  %v101_v50 = vpop.permute.xlu0 %100  ;;  %4652 = vmatprep.mubr.f32.mxu0 %v339_v53  ;;  %v358_v48 = vsub.f32 %v6642_v12, %v7929_v34  ;;  %vm132_vm13 = vcmp.eq.s32.totalorder %v104_v11, %v6375_v62  ;;  %5342 = vmatpush3.bf16.msra.mxu1 %v6225_v6 }
  0xb3   :  { %vm131_vm14 = vcmp.eq.s32.totalorder %v101_v50, %v6375_v62  ;;  %4653 = vmatmul.mubr.f32.gmra.mrb[2].mxu0 %v349_v14  ;;  %v6684_v53 = vsel %vm132_vm13, 1.0, %v8067_v44  ;;  %4982 = vmatprep.mubr.msk.f32.mxu1 %vm1621_vm2, %v6380_v26  ;;  %v369_v11 = vand.u32 4294901760, %v368_v27  ;;  %v6715_v27 = vld [vmem:[#allocation2] sm:$0xff] }
  0xb4   :  { %8089 = vst [vmem:[#allocation58_spill] sm:$0xff] %v6684_v53  ;;  %v6687_v55 = vsel %vm131_vm14, 1.0, %v8067_v44  ;;  %v359_v57 = vand.u32 4294901760, %v358_v48  ;;  %5344 = vmatprep.subr.bf16.mxu1 %v6282_v43  ;;  %v7935_v50 = vand.u32 4294901760, %v6670_v25  ;;  %v213_v6 = vsel %vm184_vm4, %v6684_v53, 0  ;;  %5194 = vmatpush3.bf16.msra.mxu0 %v6278_v32  ;;  %8091 = vst [vmem:[#allocation60_spill] sm:$0xff] %v6715_v27 }
  0xb5   :  { %8090 = vst [vmem:[#allocation59_spill] sm:$0xff] %v6687_v55  ;;  %v210_v14 = vsel %vm184_vm4, %v6687_v55, 0  ;;  %v7934_v44 = vand.u32 4294901760, %v6668_v35  ;;  %v6699_v38 = vsub.f32 %v213_v6, %v213_v6  ;;  %v110_v48 = vpop.permute.xlu1 %109  ;;  %4983 = vmatmul.mubr.msk.f32.gmra.mrb[2].mxu1 %vm1621_vm2, %v6396_v7  ;;  %5196 = vmatprep.subr.bf16.mxu0 %v6292_v9 }
  0xb6   :  { %v6701_v34 = vsub.f32 %v210_v14, %v210_v14  ;;  %v107_v26 = vpop.permute.xlu0 %106  ;;  %4655 = vmatprep.mubr.f32.mxu0 %v359_v57  ;;  %v378_v60 = vsub.f32 %v6670_v25, %v7935_v50  ;;  %vm134_vm15 = vcmp.eq.s32.totalorder %v110_v48, %v6375_v62  ;;  %4985 = vmatprep.mubr.msk.f32.mxu1 %vm1621_vm2, %v6420_v29 }
  0xb7   :  { %vm133_vm0 = vcmp.eq.s32.totalorder %v107_v26, %v6375_v62  ;;  %4656 = vmatmul.mubr.f32.gmra.mrb[4].mxu0 %v369_v11  ;;  %v388_v32 = vsub.f32 %v6668_v35, %v7934_v44  ;;  %v6718_v57 = vsel %vm134_vm15, 1.0, %v6715_v27  ;;  %5346 = vmatpush3.bf16.msra.mxu1 %v6282_v43  ;;  %v7940_v50 = vand.u32 4294901760, %v6699_v38 }
  0xb8   :  { %8092 = vst [vmem:[#allocation61_spill] sm:$0xff] %v6718_v57  ;;  %v6721_v6 = vsel %vm133_vm0, 1.0, %v6715_v27  ;;  %v379_v14 = vand.u32 4294901760, %v378_v60  ;;  %v7941_v26 = vand.u32 4294901760, %v6701_v34  ;;  %v219_v11 = vsel %vm184_vm4, %v6718_v57, 0  ;;  %5198 = vmatpush3.bf16.msra.mxu0 %v6292_v9  ;;  %5348 = vmatprep.subr.bf16.mxu1 %v6332_v5 }
  0xb9   :  { %8093 = vst [vmem:[#allocation62_spill] sm:$0xff] %v6721_v6  ;;  %v216_v48 = vsel %vm184_vm4, %v6721_v6, 0  ;;  %v389_v44 = vand.u32 4294901760, %v388_v32  ;;  %v6733_v60 = vsub.f32 %v219_v11, %v219_v11  ;;  %v116_v29 = vpop.permute.xlu1 %115  ;;  %4986 = vmatmul.mubr.msk.f32.gmra.mrb[4].mxu1 %vm1621_vm2, %v6417_v47  ;;  %v408_v9 = vsub.f32 %v6699_v38, %v7940_v50  ;;  %5200 = vmatprep.subr.bf16.mxu0 %v6328_v8 }
  0xba   :  { %v6735_v43 = vsub.f32 %v216_v48, %v216_v48  ;;  %v113_v7 = vpop.permute.xlu0 %112  ;;  %4658 = vmatprep.mubr.f32.mxu0 %v379_v14  ;;  %v398_v32 = vsub.f32 %v6701_v34, %v7941_v26  ;;  %vm136_vm1 = vcmp.eq.s32.totalorder %v116_v29, %v6375_v62  ;;  %4988 = vmatprep.mubr.msk.f32.mxu1 %vm1621_vm2, %v6447_v28 }
  0xbb   :  { %vm135_vm3 = vcmp.eq.s32.totalorder %v113_v7, %v6375_v62  ;;  %4659 = vmatmul.mubr.f32.gmra.mrb[6].mxu0 %v389_v44  ;;  %v6750_v14 = vsel %vm136_vm1, 1.0, %v6715_v27  ;;  %5350 = vmatpush3.bf16.msra.mxu1 %v6332_v5  ;;  %v409_v50 = vand.u32 4294901760, %v408_v9  ;;  %v7946_v26 = vand.u32 4294901760, %v6733_v60 }
  0xbc   :  { %8094 = vst [vmem:[#allocation63_spill] sm:$0xff] %v6750_v14  ;;  %v6753_v11 = vsel %vm135_vm3, 1.0, %v6715_v27  ;;  %v399_v48 = vand.u32 4294901760, %v398_v32  ;;  %v225_v7 = vsel %vm184_vm4, %v6750_v14, 0  ;;  %5202 = vmatpush3.bf16.msra.mxu0 %v6328_v8  ;;  %5352 = vmatprep.subr.bf16.mxu1 %v6346_v10  ;;  %v8096_v5 = vand.u32 4294901760, %v6735_v43 }
  0xbd   :  { %8095 = vst [vmem:[#allocation64_spill] sm:$0xff] %v6753_v11  ;;  %v222_v44 = vsel %vm184_vm4, %v6753_v11, 0  ;;  %v6765_v32 = vsub.f32 %v225_v7, %v225_v7  ;;  %v122_v29 = vpop.permute.xlu1 %121  ;;  %4989 = vmatmul.mubr.msk.f32.gmra.mrb[6].mxu1 %vm1621_vm2, %v6444_v61  ;;  %v428_v8 = vsub.f32 %v6733_v60, %v7946_v26  ;;  %5204 = vmatprep.subr.bf16.mxu0 %v6336_v4 }
  0xbe   :  { %v6767_v28 = vsub.f32 %v222_v44, %v222_v44  ;;  %v119_v47 = vpop.permute.xlu0 %118  ;;  %4661 = vmatprep.mubr.f32.mxu0 %v399_v48  ;;  %v418_v9 = vsub.f32 %v6735_v43, %v8096_v5  ;;  %vm138_vm5 = vcmp.eq.s32.totalorder %v122_v29, %v6375_v62  ;;  %4991 = vmatprep.mubr.msk.f32.mxu1 %vm1621_vm2, %v6472_v40 }
  0xbf   :  { %vm137_vm6 = vcmp.eq.s32.totalorder %v119_v47, %v6375_v62  ;;  %4662 = vmatmul.mubr.f32.gmra.mrb[8].mxu0 %v409_v50  ;;  %v6782_v48 = vsel %vm138_vm5, 1.0, %v6715_v27  ;;  %5354 = vmatpush3.bf16.msra.mxu1 %v6346_v10  ;;  %v429_v50 = vand.u32 4294901760, %v428_v8  ;;  %v7952_v5 = vand.u32 4294901760, %v6765_v32 }
  0xc0   :  { %8097 = vst [vmem:[#allocation65_spill] sm:$0xff] %v6782_v48  ;;  %v6785_v7 = vsel %vm137_vm6, 1.0, %v6715_v27  ;;  %v419_v44 = vand.u32 4294901760, %v418_v9  ;;  %v7949_v29 = vand.u32 4294901760, %v6767_v28  ;;  %v231_v47 = vsel %vm184_vm4, %v6782_v48, 0  ;;  %5206 = vmatpush3.bf16.msra.mxu0 %v6336_v4  ;;  %5356 = vmatprep.subr.bf16.mxu1 %v5913_v23 }
  0xc1   :  { %8098 = vst [vmem:[#allocation66_spill] sm:$0xff] %v6785_v7  ;;  %v228_v62 = vsel %vm184_vm4, %v6785_v7, 0  ;;  %v6797_v9 = vsub.f32 %v231_v47, %v231_v47  ;;  %4992 = vmatmul.mubr.msk.f32.gmra.mrb[8].mxu1 %vm1621_vm2, %v6469_v30  ;;  %v448_v4 = vsub.f32 %v6765_v32, %v7952_v5  ;;  %5208 = vmatprep.subr.bf16.mxu0 %v6348_v31  ;;  %v8119_v5 = vld [vmem:[#allocation53_spill] sm:$0xff] }
  0xc2   :  { %v6799_v26 = vsub.f32 %v228_v62, %v228_v62  ;;  %4664 = vmatprep.mubr.f32.mxu0 %v419_v44  ;;  %v438_v10 = vsub.f32 %v6767_v28, %v7949_v29  ;;  %4994 = vmatprep.mubr.msk.f32.mxu1 %vm1621_vm2, %v6498_v42  ;;  %v8099_v62 = vsub.f32 %v6568_v18, %v6595_v63 }
  0xc3   :  { %4665 = vmatmul.mubr.f32.gmra.mrb[10].mxu0 %v429_v50  ;;  %v7950_v47 = vand.u32 4294901760, %v6797_v9  ;;  %v449_v29 = vand.u32 4294901760, %v448_v4 }
  0xc4   :  { %v439_v8 = vand.u32 4294901760, %v438_v10  ;;  %v7951_v44 = vand.u32 4294901760, %v6799_v26  ;;  %v564_v27 = vand.u32 4294901760, %v8099_v62  ;;  %5210 = vmatpush3.bf16.msra.mxu0 %v6348_v31  ;;  %v8100_v31 = vld [vmem:[#allocation44_spill] sm:$0xff] }
  0xc5   :  { %4995 = vmatmul.mubr.msk.f32.gmra.mrb[10].mxu1 %vm1621_vm2, %v6495_v52  ;;  %v468_v10 = vsub.f32 %v6797_v9, %v7950_v47  ;;  %v8117_v47 = vld [vmem:[#allocation54_spill] sm:$0xff] }
  0xc6   :  { %4667 = vmatprep.mubr.f32.mxu0 %v439_v8  ;;  %v458_v50 = vsub.f32 %v6799_v26, %v7951_v44  ;;  %4997 = vmatprep.mubr.msk.f32.mxu1 %vm1621_vm2, %v6524_v15  ;;  %v8118_v44 = vld [vmem:[#allocation51_spill] sm:$0xff] }
  0xc7   :  { %4668 = vmatmul.mubr.f32.gmra.mrb[12].mxu0 %v449_v29  ;;  %v469_v4 = vand.u32 4294901760, %v468_v10  ;;  %4697 = vmatprep.subr.mxu0 %v564_v27  ;;  %v8107_v10 = vld [vmem:[#allocation34_spill] sm:$0xff] }
  0xc8   :  { %v459_v62 = vand.u32 4294901760, %v458_v50  ;;  %4698 = vmatpush3.msra.mxu0 %v564_v27  ;;  %v8104_v27 = vld [vmem:[#allocation7_spill] sm:$0xff] }
  0xc9   :  { %4998 = vmatmul.mubr.msk.f32.gmra.mrb[12].mxu1 %vm1621_vm2, %v6521_v16  ;;  %5212 = vmatprep.subr.bf16.mxu0 %v6352_v17  ;;  %v8105_v29 = vand.u32 4294901760, %v8104_v27  ;;  %v8106_v50 = vld [vmem:[#allocation43_spill] sm:$0xff]  ;;  %v8113_v27 = vld [vmem:[#allocation50_spill] sm:$0xff] }
  0xca   :  { %4670 = vmatprep.mubr.f32.mxu0 %v459_v62  ;;  %5000 = vmatprep.mubr.msk.f32.mxu1 %vm1621_vm2, %v6550_v54  ;;  %v8108_v62 = vld [vmem:[#allocation46_spill] sm:$0xff] }
  0xcb   :  { %4671 = vmatmul.mubr.f32.gmra.mrb[14].mxu0 %v469_v4  ;;  %v8110_v4 = vld [vmem:[#allocation35_spill] sm:$0xff] }
  0xcc   :  { %4699 = vmatprep.mubr.msk.f32.mxu0 %vm184_vm4, %v6579_v49 }
  0xcd   :  { %5001 = vmatmul.mubr.msk.f32.gmra.mrb[14].mxu1 %vm1621_vm2, %v6547_v58 }
  0xce   :  { %5019 = vmatprep.mubr.f32.mxu1 %v6391_v41 }
  0xcf   :  { %4700 = vmatmul.mubr.msk.f32.vlgmr.msra.gmra.mrb[0].mxu0 %vm184_vm4, %v6576_v3 }
  0xd0   :  { %4702 = vmatprep.mubr.msk.f32.mxu0 %vm184_vm4, %v6606_v46  ;;  %5214 = vmatpush3.bf16.msra.mxu0 %v6352_v17  ;;  %v8101_v17 = vld [vmem:[#allocation9_spill] sm:$0xff] }
  0xd1   :  { %5216 = vmatprep.subr.bf16.mxu0 %v6356_v20  ;;  %5020 = vmatmul.mubr.f32.vlgmr.msra.gmra.mrb[0].mxu1 %v6409_v0 }
  0xd2   :  { %5358 = vmatpush3.bf16.msra.mxu1 %v5913_v23  ;;  %5022 = vmatprep.mubr.f32.mxu1 %v6389_v1 }
  0xd3   :  { %4703 = vmatmul.mubr.msk.f32.gmra.mrb[2].mxu0 %vm184_vm4, %v6603_v36  ;;  %5360 = vmatprep.subr.bf16.mxu1 %v5915_v24 }
  0xd4   :  { %4705 = vmatprep.mubr.msk.f32.mxu0 %vm184_vm4, %v6632_v19  ;;  %5218 = vmatpush3.bf16.msra.mxu0 %v6356_v20  ;;  %v8102_v20 = vld [vmem:[#allocation6_spill] sm:$0xff] }
  0xd5   :  { %5023 = vmatmul.mubr.f32.gmra.mrb[2].mxu1 %v6407_v59  ;;  %5220 = vmatprep.subr.bf16.mxu0 %v6360_v13 }
  0xd6   :  { %5025 = vmatprep.mubr.f32.mxu1 %v6433_v37  ;;  %5362 = vmatpush3.bf16.msra.mxu1 %v5915_v24 }
  0xd7   :  { %4706 = vmatmul.mubr.msk.f32.gmra.mrb[4].mxu0 %vm184_vm4, %v6629_v51  ;;  %5364 = vmatprep.subr.bf16.mxu1 %v5962_v39 }
  0xd8   :  { %4708 = vmatprep.mubr.msk.f32.mxu0 %vm184_vm4, %v6658_v2  ;;  %5222 = vmatpush3.bf16.msra.mxu0 %v6360_v13  ;;  %v8103_v13 = vand.u32 4294901760, %v8102_v20  ;;  %v8111_v20 = vld [vmem:[#allocation48_spill] sm:$0xff] }
  0xd9   :  { %5026 = vmatmul.mubr.f32.gmra.mrb[4].mxu1 %v6431_v45  ;;  %5224 = vmatprep.subr.bf16.mxu0 %v6364_v56 }
  0xda   :  { %5028 = vmatprep.mubr.f32.mxu1 %v8100_v31  ;;  %5366 = vmatpush3.bf16.msra.mxu1 %v5962_v39  ;;  %v5371_v8 = vpack.c.bf16 %v8105_v29, %v8103_v13  ;;  %v8112_v13 = vld [vmem:[#allocation47_spill] sm:$0xff]  ;;  %v8114_v29 = vld [vmem:[#allocation49_spill] sm:$0xff] }
  0xdb   :  { %4709 = vmatmul.mubr.msk.f32.gmra.mrb[6].mxu0 %vm184_vm4, %v6655_v21  ;;  %5368 = vmatprep.subr.bf16.mxu1 %v8101_v17 }
  0xdc   :  { %4711 = vmatprep.mubr.msk.f32.mxu0 %vm184_vm4, %v6687_v55  ;;  %5226 = vmatpush3.bf16.msra.mxu0 %v6364_v56  ;;  %v8109_v56 = vld [vmem:[#allocation45_spill] sm:$0xff]  ;;  %v8127_v55 = vld [vmem:[#allocation55_spill] sm:$0xff] }
  0xdd   :  { %5029 = vmatmul.mubr.f32.gmra.mrb[6].mxu1 %v8106_v50  ;;  %5228 = vmatprep.subr.bf16.mxu0 %v8107_v10 }
  0xde   :  { %5031 = vmatprep.mubr.f32.mxu1 %v8108_v62  ;;  %5370 = vmatpush3.bf16.msra.mxu1 %v8101_v17 }
  0xdf   :  { %4712 = vmatmul.mubr.msk.f32.gmra.mrb[8].mxu0 %vm184_vm4, %v6684_v53  ;;  %5372 = vmatprep.subr.bf16.mxu1 %v5371_v8  ;;  %v8126_v53 = vand.u32 4294901760, %v6409_v0  ;;  %v8134_v0 = vld [vmem:[#allocation13_spill] sm:$0xff] }
  0xe0   :  { %4714 = vmatprep.mubr.msk.f32.mxu0 %vm184_vm4, %v6721_v6  ;;  %5230 = vmatpush3.bf16.msra.mxu0 %v8107_v10  ;;  %v8115_v10 = vld [vmem:[#allocation8_spill] sm:$0xff] }
  0xe1   :  { %5032 = vmatmul.mubr.f32.gmra.mrb[8].mxu1 %v8109_v56  ;;  %5232 = vmatprep.subr.bf16.mxu0 %v8110_v4 }
  0xe2   :  { %5034 = vmatprep.mubr.f32.mxu1 %v8111_v20 }
  0xe3   :  { %4715 = vmatmul.mubr.msk.f32.gmra.mrb[10].mxu0 %vm184_vm4, %v6718_v57 }
  0xe4   :  { %4717 = vmatprep.mubr.msk.f32.mxu0 %vm184_vm4, %v6753_v11  ;;  %5234 = vmatpush3.bf16.msra.mxu0 %v8110_v4  ;;  %v8116_v4 = vld [vmem:[#allocation52_spill] sm:$0xff] }
  0xe5   :  { %5035 = vmatmul.mubr.f32.gmra.mrb[10].mxu1 %v8112_v13  ;;  %4747 = vmatprep.subr.mxu0 %v6568_v18 }
  0xe6   :  { %5037 = vmatprep.mubr.f32.mxu1 %v8113_v27 }
  0xe7   :  { %4718 = vmatmul.mubr.msk.f32.gmra.mrb[12].mxu0 %vm184_vm4, %v6750_v14  ;;  %v8120_v14 = vand.u32 4294901760, %v6391_v41  ;;  %v8128_v41 = vand.u32 4294901760, %v6389_v1  ;;  %v8135_v1 = vand.u32 4294901760, %v6433_v37  ;;  %v8142_v37 = vand.u32 4294901760, %v8100_v31 }
  0xe8   :  { %4720 = vmatprep.mubr.msk.f32.mxu0 %vm184_vm4, %v6785_v7  ;;  %4748 = vmatpush3.msra.mxu0 %v6568_v18  ;;  %v8121_v18 = vld [vmem:[#allocation10_spill] sm:$0xff]  ;;  %v8122_v7 = vld [vmem:[#allocation11_spill] sm:$0xff]  ;;  %v8146_v31 = vand.u32 4294901760, %v8109_v56 }
  0xe9   :  { %5038 = vmatmul.mubr.f32.gmra.mrb[12].mxu1 %v8114_v29  ;;  %5236 = vmatprep.subr.bf16.mxu0 %v8115_v10  ;;  %v8123_v11 = vand.u32 4294901760, %v8122_v7  ;;  %v8131_v7 = vld [vmem:[#allocation16_spill] sm:$0xff]  ;;  %v8153_v56 = vld [vmem:[#allocation23_spill] sm:$0xff] }
  0xea   :  { %5040 = vmatprep.mubr.f32.mxu1 %v8116_v4  ;;  %v8132_v2 = vand.u32 4294901760, %v8131_v7  ;;  %v8147_v7 = vld [vmem:[#allocation20_spill] sm:$0xff] }
  0xeb   :  { %4721 = vmatmul.mubr.msk.f32.gmra.mrb[14].mxu0 %vm184_vm4, %v6782_v48  ;;  %v8124_v48 = vld [vmem:[#allocation12_spill] sm:$0xff] }
  0xec   :  { %4749 = vmatprep.mubr.f32.mxu0 %v8117_v47  ;;  %v8125_v57 = vand.u32 4294901760, %v8124_v48 }
  0xed   :  { %5041 = vmatmul.mubr.f32.gmra.mrb[14].mxu1 %v8118_v44 }
  0xee   :  { %5059 = vmatprep.mubr.f32.mxu1 %v8120_v14  ;;  %v5375_v6 = vpack.c.bf16 %v8125_v57, %v8123_v11  ;;  %v8129_v14 = vld [vmem:[#allocation15_spill] sm:$0xff]  ;;  %v8133_v57 = vand.u32 4294901760, %v6407_v59  ;;  %v8140_v59 = vand.u32 4294901760, %v6431_v45  ;;  %v8145_v45 = vand.u32 4294901760, %v8108_v62 }
  0xef   :  { %4750 = vmatmul.mubr.f32.vlgmr.msra.gmra.mrb[0].mxu0 %v8119_v5  ;;  %v8130_v21 = vand.u32 4294901760, %v8129_v14  ;;  %v8144_v14 = vld [vmem:[#allocation17_spill] sm:$0xff]  ;;  %v8149_v62 = vand.u32 4294901760, %v8112_v13  ;;  %v8157_v13 = vand.u32 4294901760, %v8116_v4  ;;  %v8166_v4 = vand.u32 4294901760, %v6616_v22 }
  0xf0   :  { %4752 = vmatprep.mubr.f32.mxu0 %v6616_v22  ;;  %5238 = vmatpush3.bf16.msra.mxu0 %v8115_v10  ;;  %v8174_v22 = vand.u32 4294901760, %v6642_v12 }
  0xf1   :  { %5240 = vmatprep.subr.bf16.mxu0 %v8121_v18  ;;  %5060 = vmatmul.mubr.f32.vlgmr.msra.gmra.mrb[0].mxu1 %v8126_v53  ;;  %v5379_v48 = vpack.c.bf16 %v8132_v2, %v8130_v21  ;;  %v8136_v53 = vld [vmem:[#allocation18_spill] sm:$0xff] }
  0xf2   :  { %5374 = vmatpush3.bf16.msra.mxu1 %v5371_v8  ;;  %5062 = vmatprep.mubr.f32.mxu1 %v8128_v41  ;;  %v8137_v11 = vand.u32 4294901760, %v8136_v53  ;;  %v8138_v8 = vld [vmem:[#allocation19_spill] sm:$0xff]  ;;  %v8141_v41 = vld [vmem:[#allocation14_spill] sm:$0xff]  ;;  %v8154_v53 = vand.u32 4294901760, %v8153_v56  ;;  %v8173_v56 = vld [vmem:[#allocation36_spill] sm:$0xff] }
  0xf3   :  { %4753 = vmatmul.mubr.f32.gmra.mrb[2].mxu0 %v8127_v55  ;;  %5376 = vmatprep.subr.bf16.mxu1 %v5375_v6  ;;  %v8139_v21 = vand.u32 4294901760, %v8138_v8  ;;  %v8155_v8 = vand.u32 4294901760, %v8113_v27  ;;  %v8161_v27 = vld [vmem:[#allocation25_spill] sm:$0xff] }
  0xf4   :  { %4755 = vmatprep.mubr.f32.mxu0 %v6642_v12  ;;  %5242 = vmatpush3.bf16.msra.mxu0 %v8121_v18  ;;  %v8182_v12 = vand.u32 4294901760, %v6670_v25 }
  0xf5   :  { %5063 = vmatmul.mubr.f32.gmra.mrb[2].mxu1 %v8133_v57  ;;  %5244 = vmatprep.subr.bf16.mxu0 %v8134_v0  ;;  %v5383_v2 = vpack.c.bf16 %v8139_v21, %v8137_v11  ;;  %v8151_v57 = vld [vmem:[#allocation22_spill] sm:$0xff]  ;;  %v8158_v21 = vand.u32 4294901760, %v8117_v47  ;;  %v8167_v47 = vld [vmem:[#allocation39_spill] sm:$0xff] }
  0xf6   :  { %5065 = vmatprep.mubr.f32.mxu1 %v8135_v1  ;;  %5378 = vmatpush3.bf16.msra.mxu1 %v5375_v6  ;;  %v8143_v6 = vand.u32 4294901760, %v8106_v50  ;;  %v8148_v50 = vand.u32 4294901760, %v8111_v20  ;;  %v8152_v1 = vand.u32 4294901760, %v8151_v57  ;;  %v8156_v20 = vand.u32 4294901760, %v8114_v29  ;;  %v8170_v57 = vld [vmem:[#allocation27_spill] sm:$0xff] }
  0xf7   :  { %4756 = vmatmul.mubr.f32.gmra.mrb[4].mxu0 %v6640_v33  ;;  %5380 = vmatprep.subr.bf16.mxu1 %v5379_v48  ;;  %v8164_v29 = vand.u32 4294901760, %v8119_v5  ;;  %v8172_v5 = vand.u32 4294901760, %v8127_v55  ;;  %v8180_v55 = vand.u32 4294901760, %v6640_v33 }
  0xf8   :  { %4758 = vmatprep.mubr.f32.mxu0 %v6670_v25  ;;  %5246 = vmatpush3.bf16.msra.mxu0 %v8134_v0  ;;  %v5259_v11 = vpack.c.bf16 %v8154_v53, %v8152_v1  ;;  %v8171_v1 = vand.u32 4294901760, %v8170_v57  ;;  %v8175_v53 = vld [vmem:[#allocation38_spill] sm:$0xff]  ;;  %v8191_v25 = vld [vmem:[#allocation32_spill] sm:$0xff]  ;;  %v8195_v57 = vand.u32 4294901760, %v6699_v38 }
  0xf9   :  { %5066 = vmatmul.mubr.f32.gmra.mrb[4].mxu1 %v8140_v59  ;;  %5248 = vmatprep.subr.bf16.mxu0 %v8141_v41 }
  0xfa   :  { %5068 = vmatprep.mubr.f32.mxu1 %v8142_v37  ;;  %5382 = vmatpush3.bf16.msra.mxu1 %v5379_v48  ;;  %v8150_v48 = vld [vmem:[#allocation21_spill] sm:$0xff]  ;;  %v8162_v37 = vand.u32 4294901760, %v8161_v27 }
  0xfb   :  { %4759 = vmatmul.mubr.f32.gmra.mrb[6].mxu0 %v6668_v35  ;;  %5384 = vmatprep.subr.bf16.mxu1 %v5383_v2 }
  0xfc   :  { %4761 = vmatprep.mubr.f32.mxu0 %v6701_v34  ;;  %5250 = vmatpush3.bf16.msra.mxu0 %v8141_v41 }
  0xfd   :  { %5069 = vmatmul.mubr.f32.gmra.mrb[6].mxu1 %v8143_v6  ;;  %5252 = vmatprep.subr.bf16.mxu0 %v8144_v14 }
  0xfe   :  { %5071 = vmatprep.mubr.f32.mxu1 %v8145_v45  ;;  %5386 = vmatpush3.bf16.msra.mxu1 %v5383_v2  ;;  %v8159_v2 = vld [vmem:[#allocation24_spill] sm:$0xff]  ;;  %v8163_v45 = vand.u32 4294901760, %v8118_v44 }
  0xff   :  { %4762 = vmatmul.mubr.f32.gmra.mrb[8].mxu0 %v6699_v38  ;;  %5388 = vmatprep.subr.bf16.mxu1 %v5913_v23  ;;  %v8160_v59 = vand.u32 4294901760, %v8159_v2  ;;  %v8183_v2 = vld [vmem:[#allocation40_spill] sm:$0xff]  ;;  %v8198_v38 = vand.u32 4294901760, %v6767_v28 }
 0x100   :  { %4764 = vmatprep.mubr.f32.mxu0 %v6735_v43  ;;  %5254 = vmatpush3.bf16.msra.mxu0 %v8144_v14 }
 0x101   :  { %5072 = vmatmul.mubr.f32.gmra.mrb[8].mxu1 %v8146_v31  ;;  %5256 = vmatprep.subr.bf16.mxu0 %v8147_v7  ;;  %v5263_v6 = vpack.c.bf16 %v8162_v37, %v8160_v59  ;;  %v8165_v31 = vld [vmem:[#allocation37_spill] sm:$0xff]  ;;  %v8184_v59 = vld [vmem:[#allocation30_spill] sm:$0xff]  ;;  %v8186_v37 = vld [vmem:[#allocation31_spill] sm:$0xff] }
 0x102   :  { %5074 = vmatprep.mubr.f32.mxu1 %v8148_v50  ;;  %v8168_v50 = vld [vmem:[#allocation26_spill] sm:$0xff]  ;;  %v8185_v27 = vand.u32 4294901760, %v8184_v59  ;;  %v8187_v33 = vand.u32 4294901760, %v8186_v37 }
 0x103   :  { %4765 = vmatmul.mubr.f32.gmra.mrb[10].mxu0 %v6733_v60 }
 0x104   :  { %4767 = vmatprep.mubr.f32.mxu0 %v6767_v28  ;;  %5258 = vmatpush3.bf16.msra.mxu0 %v8147_v7  ;;  %v8201_v28 = vand.u32 4294901760, %v6797_v9 }
 0x105   :  { %5075 = vmatmul.mubr.f32.gmra.mrb[10].mxu1 %v8149_v62  ;;  %4797 = vmatprep.subr.mxu0 %v8150_v48  ;;  %v8169_v62 = vand.u32 4294901760, %v8168_v50  ;;  %v8193_v50 = vld [vmem:[#allocation33_spill] sm:$0xff] }
 0x106   :  { %5077 = vmatprep.mubr.f32.mxu1 %v8155_v8 }
 0x107   :  { %4768 = vmatmul.mubr.f32.gmra.mrb[12].mxu0 %v6765_v32  ;;  %v5267_v44 = vpack.c.bf16 %v8171_v1, %v8169_v62 }
 0x108   :  { %4770 = vmatprep.mubr.f32.mxu0 %v6799_v26  ;;  %4798 = vmatpush3.msra.mxu0 %v8150_v48 }
 0x109   :  { %5078 = vmatmul.mubr.f32.gmra.mrb[12].mxu1 %v8156_v20  ;;  %5260 = vmatprep.subr.bf16.mxu0 %v5259_v11  ;;  %v8178_v20 = vld [vmem:[#allocation29_spill] sm:$0xff] }
 0x10a   :  { %5080 = vmatprep.mubr.f32.mxu1 %v8157_v13 }
 0x10b   :  { %4771 = vmatmul.mubr.f32.gmra.mrb[14].mxu0 %v6797_v9  ;;  %v8205_v9 = vld [vmem:[#allocation58_spill] sm:$0xff] }
 0x10c   :  { %4799 = vmatprep.mubr.f32.mxu0 %v8158_v21  ;;  %v8181_v21 = vld [vmem:[#allocation41_spill] sm:$0xff] }
 0x10d   :  { %5081 = vmatmul.mubr.f32.gmra.mrb[14].mxu1 %v8163_v45  ;;  %v8188_v45 = vand.u32 4294901760, %v6668_v35  ;;  %v8194_v35 = vand.u32 4294901760, %v8193_v50 }
 0x10e   :  { %5099 = vmatprep.mubr.msk.f32.mxu1 %vm1621_vm2, %v8165_v31 }
 0x10f   :  { %4800 = vmatmul.mubr.f32.vlgmr.msra.gmra.mrb[0].mxu0 %v8164_v29  ;;  %v8189_v29 = vld [vmem:[#allocation42_spill] sm:$0xff] }
 0x110   :  { %4802 = vmatprep.mubr.f32.mxu0 %v8166_v4  ;;  %5262 = vmatpush3.bf16.msra.mxu0 %v5259_v11  ;;  %v8176_v11 = vld [vmem:[#allocation28_spill] sm:$0xff]  ;;  %v8192_v4 = vand.u32 4294901760, %v8191_v25 }
 0x111   :  { %5264 = vmatprep.subr.bf16.mxu0 %v5263_v6  ;;  %5100 = vmatmul.mubr.msk.f32.vlgmr.msra.gmra.mrb[0].mxu1 %vm1621_vm2, %v8167_v47  ;;  %v8177_v8 = vand.u32 4294901760, %v8176_v11 }
 0x112   :  { %5390 = vmatpush3.bf16.msra.mxu1 %v5913_v23  ;;  %5102 = vmatprep.mubr.msk.f32.mxu1 %vm1621_vm2, %v8173_v56  ;;  %v8179_v23 = vand.u32 4294901760, %v8178_v20  ;;  %v5279_v62 = vpack.c.bf16 %v8194_v35, %v8192_v4 }
 0x113   :  { %4803 = vmatmul.mubr.f32.gmra.mrb[2].mxu0 %v8172_v5  ;;  %5392 = vmatprep.subr.bf16.mxu1 %v5915_v24  ;;  %v8213_v5 = vld [vmem:[#allocation60_spill] sm:$0xff] }
 0x114   :  { %4805 = vmatprep.mubr.f32.mxu0 %v8174_v22  ;;  %5266 = vmatpush3.bf16.msra.mxu0 %v5263_v6  ;;  %v5271_v13 = vpack.c.bf16 %v8179_v23, %v8177_v8  ;;  %v5275_v6 = vpack.c.bf16 %v8187_v33, %v8185_v27  ;;  %v7988_v27 = vmov 1.0  }
 0x115   :  { %5103 = vmatmul.mubr.msk.f32.gmra.mrb[2].mxu1 %vm1621_vm2, %v8175_v53  ;;  %5268 = vmatprep.subr.bf16.mxu0 %v5267_v44 }
 0x116   :  { %5105 = vmatprep.mubr.msk.f32.mxu1 %vm1621_vm2, %v8181_v21  ;;  %5394 = vmatpush3.bf16.msra.mxu1 %v5915_v24  ;;  %v8190_v24 = vand.u32 4294901760, %v6701_v34  ;;  %v8197_v34 = vand.u32 4294901760, %v6733_v60  ;;  %v8200_v60 = vand.u32 4294901760, %v6799_v26  ;;  %v8203_v26 = vld [vmem:[#allocation56_spill] sm:$0xff] }
 0x117   :  { %4806 = vmatmul.mubr.f32.gmra.mrb[4].mxu0 %v8180_v55  ;;  %5396 = vmatprep.subr.bf16.mxu1 %v5962_v39 }
 0x118   :  { %4808 = vmatprep.mubr.f32.mxu0 %v8182_v12  ;;  %5270 = vmatpush3.bf16.msra.mxu0 %v5267_v44 }
 0x119   :  { %5106 = vmatmul.mubr.msk.f32.gmra.mrb[4].mxu1 %vm1621_vm2, %v8183_v2  ;;  %5272 = vmatprep.subr.bf16.mxu0 %v5271_v13 }
 0x11a   :  { %5108 = vmatprep.mubr.msk.f32.mxu1 %vm1621_vm2, %v8189_v29  ;;  %5398 = vmatpush3.bf16.msra.mxu1 %v5962_v39  ;;  %v8196_v39 = vand.u32 4294901760, %v6735_v43  ;;  %v8199_v43 = vand.u32 4294901760, %v6765_v32  ;;  %v8204_v32 = vld [vmem:[#allocation59_spill] sm:$0xff] }
 0x11b   :  { %4809 = vmatmul.mubr.f32.gmra.mrb[6].mxu0 %v8188_v45  ;;  %5400 = vmatprep.subr.bf16.mxu1 %v8101_v17 }
 0x11c   :  { %4811 = vmatprep.mubr.f32.mxu0 %v8190_v24  ;;  %5274 = vmatpush3.bf16.msra.mxu0 %v5271_v13 }
 0x11d   :  { %5109 = vmatmul.mubr.msk.f32.gmra.mrb[6].mxu1 %vm1621_vm2, %v6444_v61  ;;  %5276 = vmatprep.subr.bf16.mxu0 %v5275_v6 }
 0x11e   :  { %5111 = vmatprep.mubr.msk.f32.mxu1 %vm1621_vm2, %v6472_v40  ;;  %5402 = vmatpush3.bf16.msra.mxu1 %v8101_v17  ;;  %v8206_v17 = vld [vmem:[#allocation62_spill] sm:$0xff] }
 0x11f   :  { %4812 = vmatmul.mubr.f32.gmra.mrb[8].mxu0 %v8195_v57 }
 0x120   :  { %4814 = vmatprep.mubr.f32.mxu0 %v8196_v39  ;;  %5278 = vmatpush3.bf16.msra.mxu0 %v5275_v6 }
 0x121   :  { %5112 = vmatmul.mubr.msk.f32.gmra.mrb[8].mxu1 %vm1621_vm2, %v6469_v30  ;;  %5280 = vmatprep.subr.bf16.mxu0 %v5279_v62 }
 0x122   :  { %5114 = vmatprep.mubr.msk.f32.mxu1 %vm1621_vm2, %v6498_v42 }
 0x123   :  { %4815 = vmatmul.mubr.f32.gmra.mrb[10].mxu0 %v8197_v34 }
 0x124   :  { %4817 = vmatprep.mubr.f32.mxu0 %v8198_v38  ;;  %5282 = vmatpush3.bf16.msra.mxu0 %v5279_v62 }
 0x125   :  { %5115 = vmatmul.mubr.msk.f32.gmra.mrb[10].mxu1 %vm1621_vm2, %v6495_v52  ;;  %4847 = vmatprep.subr.mxu0 %v6595_v63 }
 0x126   :  { %5117 = vmatprep.mubr.msk.f32.mxu1 %vm1621_vm2, %v6524_v15 }
 0x127   :  { %4818 = vmatmul.mubr.f32.gmra.mrb[12].mxu0 %v8199_v43 }
 0x128   :  { %4820 = vmatprep.mubr.f32.mxu0 %v8200_v60  ;;  %4848 = vmatpush3.msra.mxu0 %v6595_v63  ;;  %v8202_v63 = vld [vmem:[#allocation57_spill] sm:$0xff] }
 0x129   :  { %5118 = vmatmul.mubr.msk.f32.gmra.mrb[12].mxu1 %vm1621_vm2, %v6521_v16  ;;  %5284 = vmatprep.subr.bf16.mxu0 %v8115_v10 }
 0x12a   :  { %5120 = vmatprep.mubr.msk.f32.mxu1 %vm1621_vm2, %v6550_v54 }
 0x12b   :  { %4821 = vmatmul.mubr.f32.gmra.mrb[14].mxu0 %v8201_v28 }
 0x12c   :  { %4849 = vmatprep.mubr.msk.f32.mxu0 %vm184_vm4, %v6579_v49 }
 0x12d   :  { %5121 = vmatmul.mubr.msk.f32.gmra.mrb[14].mxu1 %vm1621_vm2, %v6547_v58 }
 0x12e   :  { %5139 = vmatprep.mubr.msk.f32.mxu1 %vm1621_vm2, %v8165_v31 }
 0x12f   :  { %4850 = vmatmul.mubr.msk.f32.vlgmr.msra.gmra.mrb[0].mxu0 %vm184_vm4, %v6576_v3 }
 0x130   :  { %4852 = vmatprep.mubr.msk.f32.mxu0 %vm184_vm4, %v6606_v46  ;;  %5286 = vmatpush3.bf16.msra.mxu0 %v8115_v10  ;;  %v8207_v10 = vld [vmem:[#allocation61_spill] sm:$0xff] }
 0x131   :  { %5288 = vmatprep.subr.bf16.mxu0 %v8121_v18  ;;  %5140 = vmatmul.mubr.msk.f32.vlgmr.msra.gmra.mrb[0].mxu1 %vm1621_vm2, %v8167_v47 }
 0x132   :  { %5142 = vmatprep.mubr.msk.f32.mxu1 %vm1621_vm2, %v8173_v56 }
 0x133   :  { %4853 = vmatmul.mubr.msk.f32.gmra.mrb[2].mxu0 %vm184_vm4, %v6603_v36 }
 0x134   :  { %4855 = vmatprep.mubr.msk.f32.mxu0 %vm184_vm4, %v6632_v19  ;;  %5290 = vmatpush3.bf16.msra.mxu0 %v8121_v18 }
 0x135   :  { %5292 = vmatprep.subr.bf16.mxu0 %v8134_v0  ;;  %5143 = vmatmul.mubr.msk.f32.gmra.mrb[2].mxu1 %vm1621_vm2, %v8175_v53 }
 0x136   :  { %5145 = vmatprep.mubr.msk.f32.mxu1 %vm1621_vm2, %v8181_v21 }
 0x137   :  { %4856 = vmatmul.mubr.msk.f32.gmra.mrb[4].mxu0 %vm184_vm4, %v6629_v51 }
 0x138   :  { %4858 = vmatprep.mubr.msk.f32.mxu0 %vm184_vm4, %v8202_v63  ;;  %5294 = vmatpush3.bf16.msra.mxu0 %v8134_v0 }
 0x139   :  { %5296 = vmatprep.subr.bf16.mxu0 %v8141_v41  ;;  %5146 = vmatmul.mubr.msk.f32.gmra.mrb[4].mxu1 %vm1621_vm2, %v8183_v2 }
 0x13a   :  { %5148 = vmatprep.mubr.msk.f32.mxu1 %vm1621_vm2, %v8189_v29 }
 0x13b   :  { %4859 = vmatmul.mubr.msk.f32.gmra.mrb[6].mxu0 %vm184_vm4, %v8203_v26 }
 0x13c   :  { %4861 = vmatprep.mubr.msk.f32.mxu0 %vm184_vm4, %v8204_v32  ;;  %5298 = vmatpush3.bf16.msra.mxu0 %v8141_v41 }
 0x13d   :  { %5300 = vmatprep.subr.bf16.mxu0 %v8144_v14  ;;  %5149 = vmatmul.mubr.msk.f32.gmra.mrb[6].mxu1 %vm1621_vm2, %v6444_v61  ;;  %v8208_v61 = vld [vmem:[#allocation64_spill] sm:$0xff] }
 0x13e   :  { %5151 = vmatprep.mubr.msk.f32.mxu1 %vm1621_vm2, %v6472_v40  ;;  %v8209_v40 = vld [vmem:[#allocation63_spill] sm:$0xff] }
 0x13f   :  { %4862 = vmatmul.mubr.msk.f32.gmra.mrb[8].mxu0 %vm184_vm4, %v8205_v9 }
 0x140   :  { %4864 = vmatprep.mubr.msk.f32.mxu0 %vm184_vm4, %v8206_v17  ;;  %5302 = vmatpush3.bf16.msra.mxu0 %v8144_v14 }
 0x141   :  { %5304 = vmatprep.subr.bf16.mxu0 %v8147_v7  ;;  %5152 = vmatmul.mubr.msk.f32.gmra.mrb[8].mxu1 %vm1621_vm2, %v6469_v30  ;;  %v8210_v30 = vld [vmem:[#allocation66_spill] sm:$0xff] }
 0x142   :  { %5154 = vmatprep.mubr.msk.f32.mxu1 %vm1621_vm2, %v6498_v42  ;;  %v8211_v42 = vld [vmem:[#allocation65_spill] sm:$0xff] }
 0x143   :  { %4865 = vmatmul.mubr.msk.f32.gmra.mrb[10].mxu0 %vm184_vm4, %v8207_v10 }
 0x144   :  { %4867 = vmatprep.mubr.msk.f32.mxu0 %vm184_vm4, %v8208_v61  ;;  %5306 = vmatpush3.bf16.msra.mxu0 %v8147_v7  ;;  %v2944_v7 = vld [vmem:[%s7816_s0] sm:$0x3]  ;;  %s5793_s0 = smov [#allocation3]  }
 0x145   :  { %4897 = vmatprep.subr.mxu0 %v8150_v48  ;;  %5155 = vmatmul.mubr.msk.f32.gmra.mrb[10].mxu1 %vm1621_vm2, %v6495_v52  ;;  %s3922_s20 = sshll.u32 %s5793_s0, 4  ;;  %s3923_s20 = int_to_ptr.vmem [resolvable:$true] %s3922_s20 }
 0x146   :  { %5157 = vmatprep.mubr.msk.f32.mxu1 %vm1621_vm2, %v6524_v15  ;;  %s5765_s21 = scalar_lea.vmem %s3923_s20, 256  ;;  %p5770_p1 = scmp.lt.s32.totalorder %s3923_s20, %s3923_s20 }
 0x147   :  { %4868 = vmatmul.mubr.msk.f32.gmra.mrb[12].mxu0 %vm184_vm4, %v8209_v40  ;;  %p5766_p0 = scmp.ne.s32.totalorder %s3923_s20, %s5765_s21  ;;  %p5771_p2 = scmp.lt.s32.totalorder %s5765_s21, %s5765_s21 }
 0x148   :  { %4870 = vmatprep.mubr.msk.f32.mxu0 %vm184_vm4, %v8210_v30  ;;  %4898 = vmatpush3.msra.mxu0 %v8150_v48 }
 0x149   :  { %5158 = vmatmul.mubr.msk.f32.gmra.mrb[12].mxu1 %vm1621_vm2, %v6521_v16  ;;  %p5772_p3 = por %p5771_p2, %p5770_p1 }
 0x14a   :  { %5160 = vmatprep.mubr.msk.f32.mxu1 %vm1621_vm2, %v6550_v54 }
 0x14b   :  { %4871 = vmatmul.mubr.msk.f32.gmra.mrb[14].mxu0 %vm184_vm4, %v8211_v42  ;;  %p5773_p4 = pnand %p5772_p3, %p5766_p0 }
 0x14c   :  { %4899 = vmatprep.mubr.msk.f32.mxu0 %vm184_vm4, %v6579_v49 }
 0x14d   :  { %5161 = vmatmul.mubr.msk.f32.gmra.mrb[14].mxu1 %vm1621_vm2, %v6547_v58 }
 0x14f   :  { %4900 = vmatmul.mubr.msk.f32.vlgmr.msra.gmra.mrb[0].mxu0 %vm184_vm4, %v6576_v3 }
 0x150   :  { %4902 = vmatprep.mubr.msk.f32.mxu0 %vm184_vm4, %v6606_v46 }
 0x153   :  { %4903 = vmatmul.mubr.msk.f32.gmra.mrb[2].mxu0 %vm184_vm4, %v6603_v36 }
 0x154   :  { %4905 = vmatprep.mubr.msk.f32.mxu0 %vm184_vm4, %v6632_v19  ;;  %v8212_v19 = vlaneseq }
 0x156   :  { %v7200_v18 = vshrl.u32 %v8212_v19, 7 }
 0x157   :  { %4906 = vmatmul.mubr.msk.f32.gmra.mrb[4].mxu0 %vm184_vm4, %v6629_v51 }
 0x158   :  { %4908 = vmatprep.mubr.msk.f32.mxu0 %vm184_vm4, %v8202_v63  ;;  %v2951_v41 = vsub.s32 1, %v7200_v18  ;;  %v2947_v48 = vsub.s32 0, %v7200_v18  ;;  %v7247_v25 = vadd.s32 8, %v7200_v18 }
 0x15a   :  { %v7209_v31 = vrot.slane %v2944_v7, %v2951_v41  ;;  %v7211_v47 = vrot.slane %v2944_v7, %v2947_v48 }
 0x15b   :  { %4909 = vmatmul.mubr.msk.f32.gmra.mrb[6].mxu0 %vm184_vm4, %v8203_v26 }
 0x15c   :  { %4911 = vmatprep.mubr.msk.f32.mxu0 %vm184_vm4, %v8204_v32  ;;  %vm2954_vm2 = vcmp.eq.s32.totalorder %v7209_v31, %v7200_v18  ;;  %vm2956_vm8 = vcmp.eq.s32.totalorder %v7209_v31, %v7247_v25  ;;  %vm2955_vm9 = vcmp.eq.s32.totalorder %v7211_v47, %v7247_v25 }
 0x15d   :  { %v4062_v56 = vsel %vm2954_vm2, 1.0, %v8213_v5 }
 0x15e   :  { %v7223_v22 = vsub.f32 %v4062_v56, %v4062_v56 }
 0x15f   :  { %4912 = vmatmul.mubr.msk.f32.gmra.mrb[8].mxu0 %vm184_vm4, %v8205_v9 }
 0x160   :  { %4914 = vmatprep.mubr.msk.f32.mxu0 %vm184_vm4, %v8206_v17  ;;  %v7987_v11 = vand.u32 4294901760, %v7223_v22 }
 0x162   :  { %v3096_v13 = vsub.f32 %v7223_v22, %v7987_v11 }
 0x163   :  { %4915 = vmatmul.mubr.msk.f32.gmra.mrb[10].mxu0 %vm184_vm4, %v8207_v10 }
 0x164   :  { %4917 = vmatprep.mubr.msk.f32.mxu0 %vm184_vm4, %v8208_v61  ;;  %v3097_v55 = vand.u32 4294901760, %v3096_v13 }
 0x166   :  { %3098 = vmatprep.mubr.f32.mxu1 %v3097_v55  ;;  %v4064_v55 = vsel %vm2956_vm8, 1.0, %v8213_v5 }
 0x167   :  { %4918 = vmatmul.mubr.msk.f32.gmra.mrb[12].mxu0 %vm184_vm4, %v8209_v40 }
 0x168   :  { %4920 = vmatprep.mubr.msk.f32.mxu0 %vm184_vm4, %v8210_v30 }
 0x16b   :  { %4921 = vmatmul.mubr.msk.f32.gmra.mrb[14].mxu0 %vm184_vm4, %v8211_v42  ;;  %vm2953_vm4 = vcmp.eq.s32.totalorder %v7211_v47, %v7200_v18 }
 0x16c   :  { %4065 = vmatprep.mubr.msk.f32.mxu0 %vm2954_vm2, %v7988_v27  ;;  %v4061_v9 = vsel %vm2953_vm4, 1.0, %v8213_v5 }
 0x204   :  { %v5141_v51 = vpop.f32.mrb[0].mxu1 }
 0x205   :  { %2874 = vrot.lane.b32.xlu1 %v5141_v51, %s5791_s1  ;;  %v2762_v49 = vpop.f32.mrb[1].mxu1  ;;  %v7282_v51 = vsub.f32 %v4061_v9, %v4061_v9 }
 0x206   :  { %2872 = vrot.lane.b32.xlu0 %v2762_v49, %s5791_s1 }
 0x207   :  { %8214 = vst [vmem:[#allocation44_spill] sm:$0xff] %v7282_v51  ;;  %v7978_v19 = vand.u32 4294901760, %v7282_v51 }
 0x208   :  { %v5144_v52 = vpop.f32.mrb[2].mxu1 }
 0x209   :  { %2878 = vrot.lane.b32.xlu1 %v5144_v52, %s5791_s1  ;;  %v2774_v16 = vpop.f32.mrb[3].mxu1  ;;  %v7323_v13 = vsub.f32 %v7282_v51, %v7978_v19 }
 0x20a   :  { %2876 = vrot.lane.b32.xlu0 %v2774_v16, %s5791_s1 }
 0x20c   :  { %v5147_v15 = vpop.f32.mrb[4].mxu1 }
 0x20d   :  { %2882 = vrot.lane.b32.xlu1 %v5147_v15, %s5791_s1  ;;  %v2786_v58 = vpop.f32.mrb[5].mxu1 }
 0x20e   :  { %2880 = vrot.lane.b32.xlu0 %v2786_v58, %s5791_s1 }
 0x210   :  { %v5150_v54 = vpop.f32.mrb[6].mxu1 }
 0x211   :  { %2886 = vrot.lane.b32.xlu1 %v5150_v54, %s5791_s1  ;;  %v2798_v3 = vpop.f32.mrb[7].mxu1 }
 0x212   :  { %2884 = vrot.lane.b32.xlu0 %v2798_v3, %s5791_s1 }
 0x214   :  { %v5153_v46 = vpop.f32.mrb[8].mxu1 }
 0x215   :  { %2890 = vrot.lane.b32.xlu1 %v5153_v46, %s5791_s1  ;;  %v2810_v36 = vpop.f32.mrb[9].mxu1 }
 0x216   :  { %2888 = vrot.lane.b32.xlu0 %v2810_v36, %s5791_s1 }
 0x218   :  { %v5156_v0 = vpop.f32.mrb[10].mxu1 }
 0x219   :  { %2894 = vrot.lane.b32.xlu1 %v5156_v0, %s5791_s1  ;;  %v2822_v14 = vpop.f32.mrb[11].mxu1 }
 0x21a   :  { %2892 = vrot.lane.b32.xlu0 %v2822_v14, %s5791_s1 }
 0x21c   :  { %v5159_v1 = vpop.f32.mrb[12].mxu1 }
 0x21d   :  { %2898 = vrot.lane.b32.xlu1 %v5159_v1, %s5791_s1  ;;  %v2834_v44 = vpop.f32.mrb[13].mxu1 }
 0x21e   :  { %2896 = vrot.lane.b32.xlu0 %v2834_v44, %s5791_s1 }
 0x220   :  { %v5162_v53 = vpop.f32.mrb[14].mxu1 }
 0x221   :  { %2902 = vrot.lane.b32.xlu1 %v5162_v53, %s5791_s1  ;;  %v2846_v20 = vpop.f32.mrb[15].mxu1 }
 0x222   :  { %v4901_v8 = vpop.f32.mrb[0].mxu0  ;;  %2900 = vrot.lane.b32.xlu0 %v2846_v20, %s5791_s1 }
 0x223   :  { %1486 = vst.msk [vmem:[#allocation2 + $0x8] sm:$0xff] %vm1484_vm7, %v4901_v8  ;;  %v1390_v23 = vpop.f32.mrb[1].mxu0 }
 0x224   :  { %1485 = vst.msk [vmem:[#allocation2] sm:$0xff] %vm1484_vm7, %v1390_v23 }
 0x226   :  { %v4904_v21 = vpop.f32.mrb[2].mxu0 }
 0x227   :  { %1488 = vst.msk [vmem:[#allocation2 + $0x18] sm:$0xff] %vm1484_vm7, %v4904_v21  ;;  %v1402_v12 = vpop.f32.mrb[3].mxu0 }
 0x228   :  { %1487 = vst.msk [vmem:[#allocation2 + $0x10] sm:$0xff] %vm1484_vm7, %v1402_v12 }
 0x22a   :  { %v4907_v2 = vpop.f32.mrb[4].mxu0  ;;  %v2966_v39 = vld [vmem:[#allocation2 + $0x8] sm:$0xff] }
 0x22b   :  { %1490 = vst.msk [vmem:[#allocation2 + $0x28] sm:$0xff] %vm1484_vm7, %v4907_v2  ;;  %v1414_v59 = vpop.f32.mrb[5].mxu0  ;;  %v2965_v57 = vld [vmem:[#allocation2] sm:$0xff]  ;;  %v3001_v60 = vand.u32 4294901760, %v2966_v39 }
 0x22c   :  { %1489 = vst.msk [vmem:[#allocation2 + $0x20] sm:$0xff] %vm1484_vm7, %v1414_v59  ;;  %v2998_v43 = vand.u32 4294901760, %v2965_v57 }
 0x22d   :  { %v7280_v42 = vsub.f32 %v2966_v39, %v3001_v60 }
 0x22e   :  { %v4910_v37 = vpop.f32.mrb[6].mxu0  ;;  %v7260_v38 = vld [vmem:[#allocation2 + $0x18] sm:$0xff]  ;;  %v7278_v30 = vsub.f32 %v2965_v57, %v2998_v43 }
 0x22f   :  { %1492 = vst.msk [vmem:[#allocation2 + $0x38] sm:$0xff] %vm1484_vm7, %v4910_v37  ;;  %v1426_v33 = vpop.f32.mrb[7].mxu0  ;;  %v7258_v34 = vld [vmem:[#allocation2 + $0x10] sm:$0xff]  ;;  %v3007_v32 = vand.u32 4294901760, %v7260_v38  ;;  %v7983_v46 = vand.u32 4294901760, %v7280_v42 }
 0x230   :  { %1491 = vst.msk [vmem:[#allocation2 + $0x30] sm:$0xff] %vm1484_vm7, %v1426_v33  ;;  %v3004_v26 = vand.u32 4294901760, %v7258_v34  ;;  %v7984_v3 = vand.u32 4294901760, %v7278_v30 }
 0x231   :  { %v7288_v52 = vsub.f32 %v7260_v38, %v3007_v32  ;;  %v3135_v8 = vsub.f32 %v7280_v42, %v7983_v46 }
 0x232   :  { %v4913_v6 = vpop.f32.mrb[8].mxu0  ;;  %v7264_v63 = vld [vmem:[#allocation2 + $0x28] sm:$0xff]  ;;  %v7285_v49 = vsub.f32 %v7258_v34, %v3004_v26  ;;  %v3128_v53 = vsub.f32 %v7278_v30, %v7984_v3 }
 0x233   :  { %1494 = vst.msk [vmem:[#allocation2 + $0x48] sm:$0xff] %vm1484_vm7, %v4913_v6  ;;  %v1438_v45 = vpop.f32.mrb[9].mxu0  ;;  %v7262_v28 = vld [vmem:[#allocation2 + $0x20] sm:$0xff]  ;;  %v3013_v10 = vand.u32 4294901760, %v7264_v63  ;;  %v7981_v7 = vand.u32 4294901760, %v7288_v52 }
 0x234   :  { %1493 = vst.msk [vmem:[#allocation2 + $0x40] sm:$0xff] %vm1484_vm7, %v1438_v45  ;;  %v3010_v17 = vand.u32 4294901760, %v7262_v28  ;;  %v7982_v14 = vand.u32 4294901760, %v7285_v49 }
 0x235   :  { %v7296_v54 = vsub.f32 %v7264_v63, %v3013_v10  ;;  %v3149_v2 = vsub.f32 %v7288_v52, %v7981_v7 }
 0x236   :  { %v4916_v29 = vpop.f32.mrb[10].mxu0  ;;  %v7276_v40 = vld [vmem:[#allocation2 + $0x38] sm:$0xff]  ;;  %v7293_v58 = vsub.f32 %v7262_v28, %v3010_v17  ;;  %v3142_v12 = vsub.f32 %v7285_v49, %v7982_v14 }
 0x237   :  { %1496 = vst.msk [vmem:[#allocation2 + $0x58] sm:$0xff] %vm1484_vm7, %v4916_v29  ;;  %v1450_v24 = vpop.f32.mrb[11].mxu0  ;;  %v7274_v61 = vld [vmem:[#allocation2 + $0x30] sm:$0xff]  ;;  %v3019_v15 = vand.u32 4294901760, %v7276_v40  ;;  %v7979_v56 = vand.u32 4294901760, %v7296_v54  ;;  %v3129_v29 = vand.u32 4294901760, %v3128_v53 }
 0x238   :  { %1495 = vst.msk [vmem:[#allocation2 + $0x50] sm:$0xff] %vm1484_vm7, %v1450_v24  ;;  %v3016_v16 = vand.u32 4294901760, %v7274_v61  ;;  %v7980_v44 = vand.u32 4294901760, %v7293_v58  ;;  %v3136_v24 = vand.u32 4294901760, %v3135_v8  ;;  %v3143_v38 = vand.u32 4294901760, %v3142_v12 }
 0x239   :  { %v7307_v41 = vsub.f32 %v7276_v40, %v3019_v15  ;;  %v3163_v45 = vsub.f32 %v7296_v54, %v7979_v56  ;;  %v3150_v28 = vand.u32 4294901760, %v3149_v2 }
 0x23a   :  { %v4919_v4 = vpop.f32.mrb[12].mxu0  ;;  %v7300_v36 = vld [vmem:[#allocation2 + $0x48] sm:$0xff]  ;;  %v7304_v0 = vsub.f32 %v7274_v61, %v3016_v16  ;;  %v3156_v6 = vsub.f32 %v7293_v58, %v7980_v44  ;;  %v7368_v53 = vpack.c.bf16 %v3136_v24, %v3129_v29  ;;  %v7371_v12 = vpack.c.bf16 %v3019_v15, %v3016_v16 }
 0x23b   :  { %1498 = vst.msk [vmem:[#allocation2 + $0x68] sm:$0xff] %vm1484_vm7, %v4919_v4  ;;  %v1462_v50 = vpop.f32.mrb[13].mxu0  ;;  %v2973_v48 = vld [vmem:[#allocation2 + $0x40] sm:$0xff]  ;;  %v3025_v1 = vand.u32 4294901760, %v7300_v36  ;;  %v7974_v37 = vand.u32 4294901760, %v7307_v41  ;;  %v7348_v4 = vsub.f32 %v4064_v55, %v4064_v55  ;;  %v3164_v40 = vand.u32 4294901760, %v3163_v45 }
 0x23c   :  { %1497 = vst.msk [vmem:[#allocation2 + $0x60] sm:$0xff] %vm1484_vm7, %v1462_v50  ;;  %v3022_v23 = vand.u32 4294901760, %v2973_v48  ;;  %v7976_v59 = vand.u32 4294901760, %v7304_v0  ;;  %v3157_v61 = vand.u32 4294901760, %v3156_v6  ;;  %8218 = vst [vmem:[#allocation43_spill] sm:$0xff] %v7371_v12  ;;  %v7379_v6 = vpack.c.bf16 %v3150_v28, %v3143_v38 }
 0x23d   :  { %v7340_v33 = vsub.f32 %v7300_v36, %v3025_v1  ;;  %8216 = vst [vmem:[#allocation6_spill] sm:$0xff] %v7348_v4 }
 0x23e   :  { %v4922_v35 = vpop.f32.mrb[14].mxu0  ;;  %v2976_v57 = vld [vmem:[#allocation2 + $0x58] sm:$0xff]  ;;  %v3170_v9 = vsub.f32 %v7304_v0, %v7976_v59  ;;  %v7382_v15 = vpack.c.bf16 %v3025_v1, %v3022_v23  ;;  %v7384_v24 = vpack.c.bf16 %v3164_v40, %v3157_v61 }
 0x23f   :  { %1500 = vst.msk [vmem:[#allocation2 + $0x78] sm:$0xff] %vm1484_vm7, %v4922_v35  ;;  %v1474_v62 = vpop.f32.mrb[15].mxu0  ;;  %8215 = vst [vmem:[#allocation9_spill] sm:$0xff] %v7340_v33  ;;  %v7350_v35 = vpack.c.bf16 %v3001_v60, %v2998_v43  ;;  %v2975_v63 = vld [vmem:[#allocation2 + $0x50] sm:$0xff]  ;;  %v3177_v43 = vsub.f32 %v7307_v41, %v7974_v37  ;;  %v7363_v60 = vpack.c.bf16 %v3007_v32, %v3004_v26  ;;  %v7973_v36 = vand.u32 4294901760, %v7340_v33 }
 0x240   :  { %1499 = vst.msk [vmem:[#allocation2 + $0x70] sm:$0xff] %vm1484_vm7, %v1474_v62  ;;  %v7352_v62 = vsub.f32 %v2973_v48, %v3022_v23  ;;  %v7366_v48 = vpack.c.bf16 %v3013_v10, %v3010_v17  ;;  %v3031_v8 = vand.u32 4294901760, %v2976_v57  ;;  %v3028_v2 = vand.u32 4294901760, %v2975_v63  ;;  %8219 = vst [vmem:[#allocation34_spill] sm:$0xff] %v7382_v15 }
 0x241   :  { %v4063_v26 = vsel %vm2955_vm9, 1.0, %v8213_v5  ;;  %v3171_v45 = vand.u32 4294901760, %v3170_v9  ;;  %v3178_v29 = vand.u32 4294901760, %v3177_v43  ;;  %v7389_v5 = vsub.f32 %v7340_v33, %v7973_v36 }
 0x242   :  { %8217 = vst [vmem:[#allocation7_spill] sm:$0xff] %v7366_v48  ;;  %v2978_v38 = vld [vmem:[#allocation2 + $0x68] sm:$0xff]  ;;  %v7400_v9 = vsub.f32 %v4063_v26, %v4063_v26  ;;  %v7406_v40 = vpack.c.bf16 %v3031_v8, %v3028_v2 }
 0x243   :  { %v3192_v59 = vand.u32 4294901760, %v7389_v5 }
 0x244   :  { %8221 = vst [vmem:[#allocation45_spill] sm:$0xff] %v7406_v40 }
 0x277   :  { %v2875_v20 = vpop.permute.xlu1 %2874 }
 0x278   :  { %2922 = vst.msk [vmem:[#allocation2 + $0x88] sm:$0xff] %vm2920_vm10, %v2875_v20  ;;  %v2873_v21 = vpop.permute.xlu0 %2872  ;;  %v7977_v20 = vand.u32 4294901760, %v7348_v4 }
 0x279   :  { %2921 = vst.msk [vmem:[#allocation2 + $0x80] sm:$0xff] %vm2920_vm10, %v2873_v21 }
 0x27a   :  { %v7398_v28 = vsub.f32 %v7348_v4, %v7977_v20 }
 0x27b   :  { %v2879_v50 = vpop.permute.xlu1 %2878 }
 0x27c   :  { %2924 = vst.msk [vmem:[#allocation2 + $0x98] sm:$0xff] %vm2920_vm10, %v2879_v50  ;;  %v2877_v34 = vpop.permute.xlu0 %2876  ;;  %v7975_v50 = vand.u32 4294901760, %v7352_v62 }
 0x27d   :  { %2923 = vst.msk [vmem:[#allocation2 + $0x90] sm:$0xff] %vm2920_vm10, %v2877_v34 }
 0x27f   :  { %v2883_v55 = vpop.permute.xlu1 %2882  ;;  %v2982_v21 = vld [vmem:[#allocation2 + $0x88] sm:$0xff] }
 0x280   :  { %2926 = vst.msk [vmem:[#allocation2 + $0xa8] sm:$0xff] %vm2920_vm10, %v2883_v55  ;;  %v2881_v32 = vpop.permute.xlu0 %2880  ;;  %v2981_v17 = vld [vmem:[#allocation2 + $0x80] sm:$0xff]  ;;  %v3049_v10 = vand.u32 4294901760, %v2982_v21  ;;  %v7393_v55 = vsub.f32 %v2976_v57, %v3031_v8  ;;  %v7411_v57 = vsub.f32 %v7352_v62, %v7975_v50  ;;  %v3037_v50 = vand.u32 4294901760, %v2978_v38 }
 0x281   :  { %2925 = vst.msk [vmem:[#allocation2 + $0xa0] sm:$0xff] %vm2920_vm10, %v2881_v32  ;;  %v3046_v16 = vand.u32 4294901760, %v2981_v17 }
 0x282   :  { %v7391_v34 = vsub.f32 %v2982_v21, %v3049_v10  ;;  %8220 = vst [vmem:[#allocation46_spill] sm:$0xff] %v7393_v55  ;;  %v2977_v21 = vld [vmem:[#allocation2 + $0x60] sm:$0xff] }
 0x283   :  { %v2887_v1 = vpop.permute.xlu1 %2886  ;;  %v7402_v23 = vpack.c.bf16 %v3049_v10, %v3046_v16  ;;  %v7404_v43 = vsub.f32 %v2981_v17, %v3046_v16  ;;  %v2984_v61 = vld [vmem:[#allocation2 + $0x98] sm:$0xff]  ;;  %v7415_v10 = vsub.f32 %v2975_v63, %v3028_v2  ;;  %v7417_v17 = vpack.c.bf16 %v3178_v29, %v3171_v45 }
 0x284   :  { %2928 = vst.msk [vmem:[#allocation2 + $0xb8] sm:$0xff] %vm2920_vm10, %v2887_v1  ;;  %v2885_v32 = vpop.permute.xlu0 %2884  ;;  %v2983_v36 = vld [vmem:[#allocation2 + $0x90] sm:$0xff]  ;;  %v3055_v26 = vand.u32 4294901760, %v2984_v61  ;;  %v7985_v37 = vand.u32 4294901760, %v7391_v34  ;;  %v3034_v2 = vand.u32 4294901760, %v2977_v21  ;;  %v7991_v45 = vand.u32 4294901760, %v7393_v55 }
 0x285   :  { %8222 = vst [vmem:[#allocation35_spill] sm:$0xff] %v7415_v10  ;;  %2927 = vst.msk [vmem:[#allocation2 + $0xb0] sm:$0xff] %vm2920_vm10, %v2885_v32  ;;  %5404 = vmatprep.subr.bf16.mxu1 %v7402_v23  ;;  %v3052_v8 = vand.u32 4294901760, %v2983_v36  ;;  %v7986_v16 = vand.u32 4294901760, %v7404_v43 }
 0x286   :  { %5406 = vmatpush3.bf16.msra.mxu1 %v7350_v35  ;;  %v7424_v1 = vsub.f32 %v2984_v61, %v3055_v26  ;;  %v3247_v63 = vsub.f32 %v7391_v34, %v7985_v37  ;;  %v3185_v61 = vand.u32 4294901760, %v7411_v57  ;;  %v7444_v37 = vsub.f32 %v2978_v38, %v3037_v50 }
 0x287   :  { %v2891_v29 = vpop.permute.xlu1 %2890  ;;  %v7430_v32 = vpack.c.bf16 %v3055_v26, %v3052_v8  ;;  %v7432_v20 = vsub.f32 %v2983_v36, %v3052_v8  ;;  %v2986_v19 = vld [vmem:[#allocation2 + $0xa8] sm:$0xff]  ;;  %v3240_v5 = vsub.f32 %v7404_v43, %v7986_v16  ;;  %v7468_v4 = vsub.f32 %v2977_v21, %v3034_v2 }
 0x288   :  { %2930 = vst.msk [vmem:[#allocation2 + $0xc8] sm:$0xff] %vm2920_vm10, %v2891_v29  ;;  %v2889_v56 = vpop.permute.xlu0 %2888  ;;  %v2985_v44 = vld [vmem:[#allocation2 + $0xa0] sm:$0xff]  ;;  %v3061_v7 = vand.u32 4294901760, %v2986_v19  ;;  %v3248_v14 = vand.u32 4294901760, %v3247_v63  ;;  %v7990_v46 = vand.u32 4294901760, %v7424_v1  ;;  %8223 = vst [vmem:[#allocation48_spill] sm:$0xff] %v7444_v37  ;;  %v7452_v29 = vpack.c.bf16 %v3037_v50, %v3034_v2 }
 0x289   :  { %2929 = vst.msk [vmem:[#allocation2 + $0xc0] sm:$0xff] %vm2920_vm10, %v2889_v56  ;;  %5408 = vmatprep.subr.bf16.mxu1 %v7430_v32  ;;  %v3058_v36 = vand.u32 4294901760, %v2985_v44  ;;  %v3241_v8 = vand.u32 4294901760, %v3240_v5  ;;  %v7994_v3 = vand.u32 4294901760, %v7432_v20  ;;  %v7457_v56 = vsub.f32 %v7393_v55, %v7991_v45 }
 0x28a   :  { %5410 = vmatpush3.bf16.msra.mxu1 %v7363_v60  ;;  %v7447_v57 = vsub.f32 %v2986_v19, %v3061_v7  ;;  %v3261_v63 = vsub.f32 %v7424_v1, %v7990_v46 }
 0x28b   :  { %v2895_v5 = vpop.permute.xlu1 %2894  ;;  %v7459_v16 = vpack.c.bf16 %v3061_v7, %v3058_v36  ;;  %v7461_v38 = vsub.f32 %v2985_v44, %v3058_v36  ;;  %v5435_v11 = vpack.c.bf16 %v3248_v14, %v3241_v8  ;;  %v2988_v27 = vld [vmem:[#allocation2 + $0xb8] sm:$0xff]  ;;  %v3254_v19 = vsub.f32 %v7432_v20, %v7994_v3  ;;  %v7497_v3 = vld [vmem:[#allocation2 + $0x70] sm:$0xff] }
 0x28c   :  { %2932 = vst.msk [vmem:[#allocation2 + $0xd8] sm:$0xff] %vm2920_vm10, %v2895_v5  ;;  %v2893_v50 = vpop.permute.xlu0 %2892  ;;  %v2987_v46 = vld [vmem:[#allocation2 + $0xb0] sm:$0xff]  ;;  %v3067_v39 = vand.u32 4294901760, %v2988_v27  ;;  %v3262_v26 = vand.u32 4294901760, %v3261_v63  ;;  %v7995_v45 = vand.u32 4294901760, %v7447_v57  ;;  %v7473_v36 = vpack.c.bf16 %v3192_v59, %v3185_v61  ;;  %v7475_v8 = vld [vmem:[#allocation2 + $0x78] sm:$0xff] }
 0x28d   :  { %2931 = vst.msk [vmem:[#allocation2 + $0xd0] sm:$0xff] %vm2920_vm10, %v2893_v50  ;;  %5412 = vmatprep.subr.bf16.mxu1 %v7459_v16  ;;  %5436 = vmatprep.subr.bf16.mxu0 %v5435_v11  ;;  %v3064_v14 = vand.u32 4294901760, %v2987_v46  ;;  %v3255_v7 = vand.u32 4294901760, %v3254_v19  ;;  %v8000_v44 = vand.u32 4294901760, %v7461_v38  ;;  %v8224_v11 = vand.u32 4294901760, %v7415_v10 }
 0x28e   :  { %5414 = vmatpush3.bf16.msra.mxu1 %v7366_v48  ;;  %5438 = vmatpush3.bf16.msra.mxu0 %v7368_v53  ;;  %v7479_v63 = vsub.f32 %v2988_v27, %v3067_v39  ;;  %v3275_v21 = vsub.f32 %v7447_v57, %v7995_v45 }
 0x28f   :  { %v7487_v2 = vsub.f32 %v7415_v10, %v8224_v11  ;;  %v2899_v61 = vpop.permute.xlu1 %2898  ;;  %v7490_v5 = vpack.c.bf16 %v3067_v39, %v3064_v14  ;;  %v7492_v19 = vsub.f32 %v2987_v46, %v3064_v14  ;;  %v5439_v50 = vpack.c.bf16 %v3262_v26, %v3255_v7  ;;  %v2990_v53 = vld [vmem:[#allocation2 + $0xc8] sm:$0xff] }
 0x290   :  { %v3268_v27 = vsub.f32 %v7461_v38, %v8000_v44  ;;  %2934 = vst.msk [vmem:[#allocation2 + $0xe8] sm:$0xff] %vm2920_vm10, %v2899_v61  ;;  %v2897_v45 = vpop.permute.xlu0 %2896  ;;  %v2989_v11 = vld [vmem:[#allocation2 + $0xc0] sm:$0xff]  ;;  %v3073_v51 = vand.u32 4294901760, %v2990_v53  ;;  %v3276_v55 = vand.u32 4294901760, %v3275_v21  ;;  %v8007_v59 = vand.u32 4294901760, %v7479_v63 }
 0x291   :  { %8225 = vst [vmem:[#allocation47_spill] sm:$0xff] %v7490_v5  ;;  %v3043_v39 = vand.u32 4294901760, %v7475_v8  ;;  %2933 = vst.msk [vmem:[#allocation2 + $0xe0] sm:$0xff] %vm2920_vm10, %v2897_v45  ;;  %5416 = vmatprep.subr.bf16.mxu1 %v7490_v5  ;;  %5440 = vmatprep.subr.bf16.mxu0 %v5439_v50  ;;  %v3070_v46 = vand.u32 4294901760, %v2989_v11  ;;  %v3040_v45 = vand.u32 4294901760, %v7497_v3  ;;  %v3199_v50 = vand.u32 4294901760, %v7487_v2 }
 0x292   :  { %v3269_v26 = vand.u32 4294901760, %v3268_v27  ;;  %5418 = vmatpush3.bf16.msra.mxu1 %v7371_v12  ;;  %5442 = vmatpush3.bf16.msra.mxu0 %v7379_v6  ;;  %v7508_v21 = vsub.f32 %v2990_v53, %v3073_v51  ;;  %v3289_v61 = vsub.f32 %v7479_v63, %v8007_v59  ;;  %v8227_v12 = vand.u32 4294901760, %v7492_v19 }
 0x293   :  { %v2903_v44 = vpop.permute.xlu1 %2902  ;;  %v7515_v27 = vpack.c.bf16 %v3073_v51, %v3070_v46  ;;  %v7517_v14 = vsub.f32 %v2989_v11, %v3070_v46  ;;  %v2992_v10 = vld [vmem:[#allocation2 + $0xd8] sm:$0xff] }
 0x294   :  { %v5443_v7 = vpack.c.bf16 %v3276_v55, %v3269_v26  ;;  %v3282_v6 = vsub.f32 %v7492_v19, %v8227_v12  ;;  %2936 = vst.msk [vmem:[#allocation2 + $0xf8] sm:$0xff] %vm2920_vm10, %v2903_v44  ;;  %v2901_v53 = vpop.permute.xlu0 %2900  ;;  %v2991_v5 = vld [vmem:[#allocation2 + $0xd0] sm:$0xff]  ;;  %v3079_v59 = vand.u32 4294901760, %v2992_v10  ;;  %v3290_v48 = vand.u32 4294901760, %v3289_v61 }
 0x295   :  { %8226 = vst [vmem:[#allocation50_spill] sm:$0xff] %v7515_v27  ;;  %v8014_v33 = vand.u32 4294901760, %v7508_v21  ;;  %2935 = vst.msk [vmem:[#allocation2 + $0xf0] sm:$0xff] %vm2920_vm10, %v2901_v53  ;;  %5420 = vmatprep.subr.bf16.mxu1 %v7515_v27  ;;  %v3076_v51 = vand.u32 4294901760, %v2991_v5  ;;  %v8017_v11 = vand.u32 4294901760, %v7517_v14  ;;  %v7529_v12 = vsub.f32 %v7475_v8, %v3043_v39 }
 0x296   :  { %5444 = vmatprep.subr.bf16.mxu0 %v5443_v7  ;;  %v3283_v55 = vand.u32 4294901760, %v3282_v6  ;;  %5422 = vmatpush3.bf16.msra.mxu1 %v7382_v15  ;;  %v7533_v44 = vsub.f32 %v2992_v10, %v3079_v59  ;;  %v8228_v26 = vand.u32 4294901760, %v7444_v37  ;;  %v7553_v27 = vsub.f32 %v7497_v3, %v3040_v45 }
 0x297   :  { %5446 = vmatpush3.bf16.msra.mxu0 %v7384_v24  ;;  %v3303_v2 = vsub.f32 %v7508_v21, %v8014_v33  ;;  %v7544_v61 = vpack.c.bf16 %v3079_v59, %v3076_v51  ;;  %v7546_v8 = vsub.f32 %v2991_v5, %v3076_v51  ;;  %v2994_v53 = vld [vmem:[#allocation2 + $0xe8] sm:$0xff]  ;;  %v3296_v24 = vsub.f32 %v7517_v14, %v8017_v11 }
 0x298   :  { %v7542_v7 = vsub.f32 %v7444_v37, %v8228_v26  ;;  %v5447_v6 = vpack.c.bf16 %v3290_v48, %v3283_v55  ;;  %v2993_v10 = vld [vmem:[#allocation2 + $0xe0] sm:$0xff]  ;;  %v3085_v15 = vand.u32 4294901760, %v2994_v53  ;;  %v8022_v46 = vand.u32 4294901760, %v7533_v44 }
 0x299   :  { %8229 = vst [vmem:[#allocation49_spill] sm:$0xff] %v7544_v61  ;;  %v3304_v33 = vand.u32 4294901760, %v3303_v2  ;;  %5424 = vmatprep.subr.bf16.mxu1 %v7544_v61  ;;  %v3082_v59 = vand.u32 4294901760, %v2993_v10  ;;  %v3297_v5 = vand.u32 4294901760, %v3296_v24  ;;  %v8025_v48 = vand.u32 4294901760, %v7546_v8 }
 0x29a   :  { %5448 = vmatprep.subr.bf16.mxu0 %v5447_v6  ;;  %v7557_v51 = vpack.c.bf16 %v3043_v39, %v3040_v45  ;;  %5426 = vmatpush3.bf16.msra.mxu1 %v7406_v40  ;;  %v7561_v55 = vsub.f32 %v2994_v53, %v3085_v15  ;;  %v3317_v3 = vsub.f32 %v7533_v44, %v8022_v46  ;;  %v8231_v2 = vand.u32 4294901760, %v7468_v4 }
 0x29b   :  { %5450 = vmatpush3.bf16.msra.mxu0 %v7417_v17  ;;  %v7570_v24 = vpack.c.bf16 %v3085_v15, %v3082_v59  ;;  %v7572_v39 = vsub.f32 %v2993_v10, %v3082_v59  ;;  %v5451_v45 = vpack.c.bf16 %v3304_v33, %v3297_v5  ;;  %v2996_v11 = vld [vmem:[#allocation2 + $0xf8] sm:$0xff]  ;;  %v3310_v17 = vsub.f32 %v7546_v8, %v8025_v48 }
 0x29c   :  { %8230 = vst [vmem:[#allocation8_spill] sm:$0xff] %v7557_v51  ;;  %v3212_v26 = vsub.f32 %v7468_v4, %v8231_v2  ;;  %v2995_v53 = vld [vmem:[#allocation2 + $0xf0] sm:$0xff]  ;;  %v3091_v40 = vand.u32 4294901760, %v2996_v11  ;;  %v3318_v61 = vand.u32 4294901760, %v3317_v3  ;;  %v8027_v46 = vand.u32 4294901760, %v7561_v55 }
 0x29d   :  { %v8026_v37 = vand.u32 4294901760, %v7553_v27  ;;  %5428 = vmatprep.subr.bf16.mxu1 %v7570_v24  ;;  %5452 = vmatprep.subr.bf16.mxu0 %v5451_v45  ;;  %v3088_v15 = vand.u32 4294901760, %v2995_v53  ;;  %v3311_v2 = vand.u32 4294901760, %v3310_v17  ;;  %v8232_v10 = vand.u32 4294901760, %v7457_v56 }
 0x29e   :  { %v8028_v59 = vand.u32 4294901760, %v7572_v39  ;;  %5430 = vmatpush3.bf16.msra.mxu1 %v7452_v29  ;;  %v7585_v5 = vsub.f32 %v2996_v11, %v3091_v40  ;;  %v3331_v3 = vsub.f32 %v7561_v55, %v8027_v46  ;;  %v3213_v48 = vand.u32 4294901760, %v3212_v26 }
 0x29f   :  { %v5457_v33 = vpack.c.bf16 %v8232_v10, %v3199_v50  ;;  %5454 = vmatpush3.bf16.msra.mxu0 %v7473_v36  ;;  %v3220_v45 = vand.u32 4294901760, %v7542_v7  ;;  %v7591_v6 = vpack.c.bf16 %v3091_v40, %v3088_v15  ;;  %v7593_v17 = vsub.f32 %v2995_v53, %v3088_v15 }
 0x2a0   :  { %v5455_v56 = vpack.c.bf16 %v3318_v61, %v3311_v2  ;;  %v3324_v50 = vsub.f32 %v7572_v39, %v8028_v59  ;;  %v3332_v10 = vand.u32 4294901760, %v3331_v3  ;;  %v8031_v36 = vand.u32 4294901760, %v7585_v5 }
 0x2a1   :  { %v3226_v11 = vsub.f32 %v7553_v27, %v8026_v37  ;;  %v8233_v26 = vand.u32 4294901760, %v7529_v12  ;;  %5432 = vmatprep.subr.bf16.mxu1 %v7591_v6  ;;  %v5467_v40 = vpack.c.bf16 %v7391_v34, %v7404_v43  ;;  %v8032_v53 = vand.u32 4294901760, %v7593_v17 }
 0x2a2   :  { %5456 = vmatprep.subr.bf16.mxu0 %v5455_v56  ;;  %v3325_v61 = vand.u32 4294901760, %v3324_v50  ;;  %v8234_v15 = vand.u32 4294901760, %v7400_v9  ;;  %5434 = vmatpush3.bf16.msra.mxu1 %v7557_v51  ;;  %v3345_v3 = vsub.f32 %v7585_v5, %v8031_v36  ;;  %v5469_v56 = vpack.c.bf16 %v7280_v42, %v7278_v30 }
 0x2a3   :  { %v3233_v7 = vsub.f32 %v7529_v12, %v8233_v26  ;;  %5458 = vmatpush3.bf16.msra.mxu0 %v5457_v33  ;;  %5468 = vmatprep.subr.bf16.mxu1 %v5467_v40  ;;  %v3338_v50 = vsub.f32 %v7593_v17, %v8032_v53  ;;  %v3112_v37 = vand.u32 4294901760, %v7398_v28  ;;  %v5461_v46 = vpack.c.bf16 %v3220_v45, %v3213_v48  ;;  %v8237_v45 = vld [vmem:[#allocation9_spill] sm:$0xff] }
 0x2a4   :  { %v3117_v2 = vsub.f32 %v7400_v9, %v8234_v15  ;;  %v5459_v26 = vpack.c.bf16 %v3332_v10, %v3325_v61  ;;  %v3346_v15 = vand.u32 4294901760, %v3345_v3  ;;  %v3227_v59 = vand.u32 4294901760, %v3226_v11  ;;  %v8241_v3 = vld [vmem:[#allocation35_spill] sm:$0xff] }
 0x2a5   :  { %v3234_v51 = vand.u32 4294901760, %v3233_v7  ;;  %v8235_v33 = vand.u32 4294901760, %v7323_v13  ;;  %v5471_v10 = vpack.c.bf16 %v7424_v1, %v7432_v20  ;;  %v3339_v40 = vand.u32 4294901760, %v3338_v50 }
 0x2a6   :  { %5460 = vmatprep.subr.bf16.mxu0 %v5459_v26  ;;  %v3118_v61 = vand.u32 4294901760, %v3117_v2  ;;  %v5473_v28 = vpack.c.bf16 %v7288_v52, %v7285_v49  ;;  %v5475_v48 = vpack.c.bf16 %v7447_v57, %v7461_v38  ;;  %v5477_v13 = vpack.c.bf16 %v7296_v54, %v7293_v58  ;;  %v8240_v2 = vld [vmem:[#allocation47_spill] sm:$0xff]  ;;  %v8242_v26 = vld [vmem:[#allocation46_spill] sm:$0xff] }
 0x2a7   :  { %3104 = vmatmul.mubr.f32.vlgmr.msra.gmra.mrb[16].mxu1 %v8235_v33  ;;  %5462 = vmatpush3.bf16.msra.mxu0 %v5461_v46  ;;  %v5463_v36 = vpack.c.bf16 %v3346_v15, %v3339_v40  ;;  %v5465_v53 = vpack.c.bf16 %v3234_v51, %v3227_v59  ;;  %v5479_v46 = vpack.c.bf16 %v7479_v63, %v7492_v19  ;;  %v8238_v11 = vand.u32 4294901760, %v7223_v22  ;;  %v8243_v15 = vld [vmem:[#allocation43_spill] sm:$0xff]  ;;  %v8245_v33 = vld [vmem:[#allocation48_spill] sm:$0xff] }
 0x2a8   :  { %5470 = vmatpush3.bf16.msra.mxu1 %v5469_v56  ;;  %3113 = vmatprep.mubr.f32.mxu1 %v3112_v37  ;;  %v8236_v37 = vmov 1.0   ;;  %v5481_v51 = vpack.c.bf16 %v7307_v41, %v7304_v0  ;;  %v5483_v59 = vpack.c.bf16 %v7508_v21, %v7517_v14  ;;  %v5487_v7 = vpack.c.bf16 %v7533_v44, %v7546_v8 }
 0x2a9   :  { %5472 = vmatprep.subr.bf16.mxu1 %v5471_v10  ;;  %5464 = vmatprep.subr.bf16.mxu0 %v5463_v36  ;;  %v5485_v36 = vpack.c.bf16 %v8237_v45, %v7352_v62  ;;  %v5489_v56 = vpack.c.bf16 %v8242_v26, %v8241_v3  ;;  %v5491_v50 = vpack.c.bf16 %v7561_v55, %v7572_v39 }
 0x2aa   :  { %v5493_v10 = vpack.c.bf16 %v8245_v33, %v7468_v4  ;;  %v5495_v40 = vpack.c.bf16 %v7585_v5, %v7593_v17 }
 0x2ab   :  { %3119 = vmatmul.mubr.f32.gmra.mrb[18].mxu1 %v3118_v61  ;;  %5466 = vmatpush3.bf16.msra.mxu0 %v5465_v53  ;;  %v8239_v53 = vld [vmem:[#allocation7_spill] sm:$0xff]  ;;  %v8246_v61 = vld [vmem:[#allocation34_spill] sm:$0xff] }
 0x2ac   :  { %5474 = vmatpush3.bf16.msra.mxu1 %v5473_v28  ;;  %5500 = vmatprep.subr.bf16.mxu0 %v7402_v23  ;;  %v8247_v28 = vld [vmem:[#allocation49_spill] sm:$0xff] }
 0x2ad   :  { %5476 = vmatprep.subr.bf16.mxu1 %v5475_v48  ;;  %3493 = vmatprep.mubr.f32.mxu1 %v7223_v22  ;;  %v8244_v22 = vld [vmem:[#allocation50_spill] sm:$0xff]  ;;  %v5497_v48 = vpack.c.bf16 %v7529_v12, %v7553_v27 }
 0x2ae   :  { %4066 = vmatmul.mubr.msk.f32.vlgmr.msra.gmra.mrb[16].mxu0 %vm2953_vm4, %v8236_v37 }
 0x2af   :  { %5502 = vmatpush3.bf16.msra.mxu0 %v7350_v35  ;;  %4067 = vmatprep.mubr.msk.f32.mxu0 %vm2956_vm8, %v8236_v37 }
 0x2b0   :  { %5478 = vmatpush3.bf16.msra.mxu1 %v5477_v13  ;;  %5504 = vmatprep.subr.bf16.mxu0 %v7430_v32  ;;  %v8248_v13 = vand.u32 4294901760, %v7404_v43  ;;  %v8255_v43 = vand.u32 4294901760, %v7424_v1  ;;  %v8260_v1 = vand.u32 4294901760, %v7447_v57  ;;  %v8265_v57 = vand.u32 4294901760, %v7492_v19 }
 0x2b1   :  { %5480 = vmatprep.subr.bf16.mxu1 %v5479_v46  ;;  %v8249_v46 = vand.u32 4294901760, %v7391_v34  ;;  %v8256_v34 = vld [vmem:[#allocation6_spill] sm:$0xff]  ;;  %v8272_v19 = vand.u32 4294901760, %v7508_v21  ;;  %v8279_v21 = vand.u32 4294901760, %v7572_v39  ;;  %v8286_v39 = vand.u32 4294901760, %v7529_v12 }
 0x2b2   :  { %4068 = vmatmul.mubr.msk.f32.gmra.mrb[18].mxu0 %vm2955_vm9, %v8236_v37 }
 0x2b3   :  { %5506 = vmatpush3.bf16.msra.mxu0 %v7363_v60  ;;  %3609 = vmatprep.mubr.f32.mxu0 %v8238_v11  ;;  %v8252_v11 = vand.u32 4294901760, %v7280_v42  ;;  %v8258_v42 = vand.u32 4294901760, %v7288_v52 }
 0x2b4   :  { %5482 = vmatpush3.bf16.msra.mxu1 %v5481_v51  ;;  %5508 = vmatprep.subr.bf16.mxu0 %v7459_v16  ;;  %v5531_v51 = vpack.c.bf16 %v8249_v46, %v8248_v13  ;;  %v8261_v13 = vld [vmem:[#allocation8_spill] sm:$0xff]  ;;  %v8262_v46 = vand.u32 4294901760, %v7293_v58  ;;  %v8267_v58 = vand.u32 4294901760, %v8256_v34 }
 0x2b5   :  { %5484 = vmatprep.subr.bf16.mxu1 %v5483_v59  ;;  %v8250_v59 = vld [vmem:[#allocation45_spill] sm:$0xff] }
 0x2b7   :  { %5510 = vmatpush3.bf16.msra.mxu0 %v8239_v53 }
 0x2b8   :  { %5486 = vmatpush3.bf16.msra.mxu1 %v5485_v36  ;;  %5512 = vmatprep.subr.bf16.mxu0 %v8240_v2  ;;  %v8251_v36 = vand.u32 4294901760, %v7278_v30  ;;  %v8257_v30 = vand.u32 4294901760, %v7285_v49  ;;  %v8263_v49 = vand.u32 4294901760, %v7296_v54  ;;  %v8268_v54 = vand.u32 4294901760, %v7304_v0 }
 0x2b9   :  { %5488 = vmatprep.subr.bf16.mxu1 %v5487_v7  ;;  %v8274_v0 = vand.u32 4294901760, %v8237_v45  ;;  %v8280_v45 = vand.u32 4294901760, %v7561_v55  ;;  %v8285_v55 = vand.u32 4294901760, %v7553_v27 }
 0x2ba   :  { %v5533_v7 = vpack.c.bf16 %v8252_v11, %v8251_v36 }
 0x2bb   :  { %5514 = vmatpush3.bf16.msra.mxu0 %v8243_v15 }
 0x2bc   :  { %5490 = vmatpush3.bf16.msra.mxu1 %v5489_v56  ;;  %5516 = vmatprep.subr.bf16.mxu0 %v8244_v22  ;;  %v8253_v56 = vld [vmem:[#allocation44_spill] sm:$0xff] }
 0x2bd   :  { %5492 = vmatprep.subr.bf16.mxu1 %v5491_v50  ;;  %v8254_v50 = vand.u32 4294901760, %v7432_v20  ;;  %v8259_v20 = vand.u32 4294901760, %v7461_v38  ;;  %v8264_v52 = vand.u32 4294901760, %v8253_v56  ;;  %v8266_v38 = vand.u32 4294901760, %v7479_v63 }
 0x2be   :  { %v8271_v63 = vand.u32 4294901760, %v7517_v14 }
 0x2bf   :  { %5518 = vmatpush3.bf16.msra.mxu0 %v8246_v61  ;;  %v5543_v36 = vpack.c.bf16 %v8266_v38, %v8265_v57 }
 0x2c0   :  { %5494 = vmatpush3.bf16.msra.mxu1 %v5493_v10  ;;  %5520 = vmatprep.subr.bf16.mxu0 %v8247_v28  ;;  %v5535_v10 = vpack.c.bf16 %v8255_v43, %v8254_v50  ;;  %v5555_v50 = vpack.c.bf16 %v8280_v45, %v8279_v21 }
 0x2c1   :  { %5496 = vmatprep.subr.bf16.mxu1 %v5495_v40  ;;  %v5537_v40 = vpack.c.bf16 %v8258_v42, %v8257_v30 }
 0x2c3   :  { %5522 = vmatpush3.bf16.msra.mxu0 %v8250_v59 }
 0x2c4   :  { %5498 = vmatpush3.bf16.msra.mxu1 %v5497_v48  ;;  %5524 = vmatprep.subr.bf16.mxu0 %v7570_v24  ;;  %v5539_v48 = vpack.c.bf16 %v8260_v1, %v8259_v20 }
 0x2c5   :  { %5532 = vmatprep.subr.bf16.mxu1 %v5531_v51  ;;  %v5541_v51 = vpack.c.bf16 %v8263_v49, %v8262_v46 }
 0x2c7   :  { %3496 = vmatmul.mubr.f32.vlgmr.msra.gmra.mrb[20].mxu1 %v8253_v56  ;;  %5526 = vmatpush3.bf16.msra.mxu0 %v7452_v29  ;;  %v5547_v56 = vpack.c.bf16 %v8272_v19, %v8271_v63 }
 0x2c8   :  { %5534 = vmatpush3.bf16.msra.mxu1 %v5533_v7  ;;  %5528 = vmatprep.subr.bf16.mxu0 %v7591_v6  ;;  %v8270_v7 = vand.u32 4294901760, %v7400_v9 }
 0x2c9   :  { %5536 = vmatprep.subr.bf16.mxu1 %v5535_v10  ;;  %3502 = vmatprep.mubr.f32.mxu1 %v8256_v34 }
 0x2cb   :  { %3505 = vmatmul.mubr.f32.gmra.mrb[22].mxu1 %v7400_v9  ;;  %5530 = vmatpush3.bf16.msra.mxu0 %v8261_v13  ;;  %v8275_v9 = vand.u32 4294901760, %v7546_v8  ;;  %v8282_v8 = vand.u32 4294901760, %v8245_v33 }
 0x2cc   :  { %5538 = vmatpush3.bf16.msra.mxu1 %v5537_v40  ;;  %5564 = vmatprep.subr.bf16.mxu0 %v7402_v23  ;;  %v8269_v23 = vand.u32 4294901760, %v7307_v41 }
 0x2cd   :  { %5540 = vmatprep.subr.bf16.mxu1 %v5539_v48  ;;  %4069 = vmatprep.mubr.msk.f32.mxu1 %vm2954_vm2, %v8236_v37 }
 0x2ce   :  { %3613 = vmatmul.mubr.f32.vlgmr.msra.gmra.mrb[20].mxu0 %v8264_v52  ;;  %v5545_v11 = vpack.c.bf16 %v8269_v23, %v8268_v54 }
 0x2cf   :  { %5566 = vmatpush3.bf16.msra.mxu0 %v7350_v35  ;;  %3620 = vmatprep.mubr.f32.mxu0 %v8267_v58  ;;  %v8273_v35 = vand.u32 4294901760, %v7352_v62  ;;  %v8277_v62 = vand.u32 4294901760, %v8241_v3  ;;  %v8284_v3 = vand.u32 4294901760, %v7585_v5 }
 0x2d0   :  { %5542 = vmatpush3.bf16.msra.mxu1 %v5541_v51  ;;  %5568 = vmatprep.subr.bf16.mxu0 %v7430_v32  ;;  %v8276_v32 = vand.u32 4294901760, %v7533_v44  ;;  %v8281_v44 = vand.u32 4294901760, %v7468_v4 }
 0x2d1   :  { %5544 = vmatprep.subr.bf16.mxu1 %v5543_v36  ;;  %v5549_v41 = vpack.c.bf16 %v8274_v0, %v8273_v35 }
 0x2d2   :  { %3624 = vmatmul.mubr.f32.gmra.mrb[22].mxu0 %v8270_v7  ;;  %v5551_v14 = vpack.c.bf16 %v8276_v32, %v8275_v9 }
 0x2d3   :  { %5570 = vmatpush3.bf16.msra.mxu0 %v7363_v60  ;;  %4073 = vmatprep.mubr.msk.f32.mxu0 %vm2954_vm2, %v8236_v37  ;;  %v8278_v60 = vand.u32 4294901760, %v8242_v26 }
 0x2d4   :  { %5546 = vmatpush3.bf16.msra.mxu1 %v5545_v11  ;;  %5572 = vmatprep.subr.bf16.mxu0 %v7459_v16 }
 0x2d5   :  { %5548 = vmatprep.subr.bf16.mxu1 %v5547_v56  ;;  %v5553_v16 = vpack.c.bf16 %v8278_v60, %v8277_v62 }
 0x2d7   :  { %5574 = vmatpush3.bf16.msra.mxu0 %v8239_v53  ;;  %v5557_v53 = vpack.c.bf16 %v8282_v8, %v8281_v44 }
 0x2d8   :  { %5550 = vmatpush3.bf16.msra.mxu1 %v5549_v41  ;;  %5576 = vmatprep.subr.bf16.mxu0 %v8240_v2  ;;  %v8283_v2 = vand.u32 4294901760, %v7593_v17 }
 0x2d9   :  { %5552 = vmatprep.subr.bf16.mxu1 %v5551_v14 }
 0x2da   :  { %v5559_v26 = vpack.c.bf16 %v8284_v3, %v8283_v2 }
 0x2db   :  { %5578 = vmatpush3.bf16.msra.mxu0 %v8243_v15  ;;  %v5561_v15 = vpack.c.bf16 %v8286_v39, %v8285_v55 }
 0x2dc   :  { %5554 = vmatpush3.bf16.msra.mxu1 %v5553_v16  ;;  %5580 = vmatprep.subr.bf16.mxu0 %v8244_v22 }
 0x2dd   :  { %5556 = vmatprep.subr.bf16.mxu1 %v5555_v50 }
 0x2df   :  { %5582 = vmatpush3.bf16.msra.mxu0 %v8246_v61 }
 0x2e0   :  { %5558 = vmatpush3.bf16.msra.mxu1 %v5557_v53  ;;  %5584 = vmatprep.subr.bf16.mxu0 %v8247_v28 }
 0x2e1   :  { %5560 = vmatprep.subr.bf16.mxu1 %v5559_v26 }
 0x2e3   :  { %5586 = vmatpush3.bf16.msra.mxu0 %v8250_v59 }
 0x2e4   :  { %5562 = vmatpush3.bf16.msra.mxu1 %v5561_v15  ;;  %5588 = vmatprep.subr.bf16.mxu0 %v7570_v24 }
 0x2e7   :  { %4070 = vmatmul.mubr.msk.f32.vlgmr.msra.gmra.mrb[24].mxu1 %vm2953_vm4, %v8236_v37  ;;  %5590 = vmatpush3.bf16.msra.mxu0 %v7452_v29 }
 0x2e8   :  { %4071 = vmatprep.mubr.msk.f32.mxu1 %vm2956_vm8, %v8236_v37  ;;  %5592 = vmatprep.subr.bf16.mxu0 %v7591_v6 }
 0x2eb   :  { %4072 = vmatmul.mubr.msk.f32.gmra.mrb[26].mxu1 %vm2955_vm9, %v8236_v37  ;;  %5594 = vmatpush3.bf16.msra.mxu0 %v8261_v13 }
 0x2ee   :  { %4074 = vmatmul.mubr.msk.f32.vlgmr.msra.gmra.mrb[24].mxu0 %vm2953_vm4, %v8236_v37 }
 0x2ef   :  { %4075 = vmatprep.mubr.msk.f32.mxu0 %vm2956_vm8, %v8236_v37 }
 0x2f2   :  { %4076 = vmatmul.mubr.msk.f32.gmra.mrb[26].mxu0 %vm2955_vm9, %v8236_v37 }
 0x37a   :  { %v4427_v4 = vpop.f32.mrb[16].mxu1 }
 0x37b   :  { %v4428_v29 = vpop.f32.mrb[17].mxu1 }
 0x37c   :  { %v4429_v27 = vadd.f32 %v4428_v29, %v4427_v4 }
 0x37e   :  { %v4430_v12 = vpop.f32.mrb[18].mxu1 }
 0x37f   :  { %v4431_v6 = vpop.f32.mrb[19].mxu1 }
 0x380   :  { %v4432_v24 = vadd.f32 %v4431_v6, %v4430_v12 }
 0x381   :  { %v4465_v5 = vpop.f32.mrb[16].mxu0 }
 0x382   :  { %v4466_v17 = vpop.f32.mrb[17].mxu0 }
 0x383   :  { %v4467_v18 = vadd.f32 %v4466_v17, %v4465_v5 }
 0x385   :  { %v3353_v22 = vadd.f32 %v4467_v18, %v4429_v27  ;;  %v4468_v33 = vpop.f32.mrb[18].mxu0 }
 0x386   :  { %v4469_v61 = vpop.f32.mrb[19].mxu0 }
 0x387   :  { %v4470_v28 = vadd.f32 %v4469_v61, %v4468_v33 }
 0x389   :  { %v3360_v31 = vadd.f32 %v4470_v28, %v4432_v24 }
 0x39a   :  { %v4503_v59 = vpop.f32.mrb[20].mxu1 }
 0x39b   :  { %v4504_v43 = vpop.f32.mrb[21].mxu1 }
 0x39c   :  { %v4505_v10 = vadd.f32 %v4504_v43, %v4503_v59 }
 0x39e   :  { %v3498_v34 = vadd.f32 %v4505_v10, %v3353_v22  ;;  %v4506_v47 = vpop.f32.mrb[22].mxu1 }
 0x39f   :  { %v4507_v25 = vpop.f32.mrb[23].mxu1 }
 0x3a0   :  { %v4508_v37 = vadd.f32 %v4507_v25, %v4506_v47 }
 0x3a1   :  { %v4541_v42 = vpop.f32.mrb[20].mxu0 }
 0x3a2   :  { %v3507_v30 = vadd.f32 %v4508_v37, %v3360_v31  ;;  %v4542_v40 = vpop.f32.mrb[21].mxu0 }
 0x3a3   :  { %v4543_v20 = vadd.f32 %v4542_v40, %v4541_v42 }
 0x3a5   :  { %v3615_v1 = vadd.f32 %v4543_v20, %v3498_v34  ;;  %v4544_v48 = vpop.f32.mrb[22].mxu0 }
 0x3a6   :  { %v4545_v13 = vpop.f32.mrb[23].mxu0 }
 0x3a7   :  { %v4546_v46 = vadd.f32 %v4545_v13, %v4544_v48 }
 0x3a9   :  { %v3626_v49 = vadd.f32 %v4546_v46, %v3507_v30 }
 0x3ba   :  { %v4579_v51 = vpop.f32.mrb[24].mxu1 }
 0x3bb   :  { %v4580_v52 = vpop.f32.mrb[25].mxu1 }
 0x3bc   :  { %v4581_v57 = vadd.f32 %v4580_v52, %v4579_v51 }
 0x3be   :  { %v3794_v38 = vadd.f32 %v4581_v57, %v3615_v1  ;;  %v4582_v36 = vpop.f32.mrb[26].mxu1 }
 0x3bf   :  { %v4583_v58 = vpop.f32.mrb[27].mxu1 }
 0x3c0   :  { %v4584_v54 = vadd.f32 %v4583_v58, %v4582_v36 }
 0x3c1   :  { %v4617_v11 = vpop.f32.mrb[24].mxu0 }
 0x3c2   :  { %v3801_v23 = vadd.f32 %v4584_v54, %v3626_v49  ;;  %v4618_v7 = vpop.f32.mrb[25].mxu0 }
 0x3c3   :  { %v4619_v63 = vadd.f32 %v4618_v7, %v4617_v11 }
 0x3c5   :  { %v3905_v19 = vadd.f32 %v4619_v63, %v3794_v38  ;;  %v4620_v56 = vpop.f32.mrb[26].mxu0 }
 0x3c6   :  { %v4621_v35 = vpop.f32.mrb[27].mxu0 }
 0x3c7   :  { %3915 = vst [vmem:[#allocation3] sm:$0xff] %v3905_v19  ;;  %v4622_v0 = vadd.f32 %v4621_v35, %v4620_v56 }
 0x3c9   :  { %v3912_v41 = vadd.f32 %v4622_v0, %v3801_v23 }
 0x3cb   :  { %3916 = vst [vmem:[#allocation3 + $0x8] sm:$0xff] %v3912_v41 }
 0x3cc   :  { %5776 = shalt.err (!%p5773_p4)
}
 0x3cd   :  { %s5777_s24 = scalar_lea.hbm %s7821_s5, 256 }
 0x3ce   :  { %p5778_p5 = scmp.ne.s32.totalorder %s7821_s5, %s5777_s24  ;;  %p5781_p6 = scmp.lt.u32.totalorder %s5777_s24, %s7821_s5 }
 0x3d0   :  { %p5783_p7 = pnand %p5781_p6, %p5778_p5 }
 0x3d2   :  { %5786 = shalt.err (!%p5783_p7)
}
 0x3d3   :  { %s5794_s3 = smov 128   ;;  %s5795_s2 = smov 8  }
 0x3d4   :  { %3928 = dma.vmem_to_hbm [thread:$0]  %s3923_s20, 256, %s7821_s5, [#allocation4], %s5794_s3, %s5794_s3, %s5795_s2  }
 0x3d5   :  { %5787 = dma.done.wait [#allocation4], 256  }
 0x3d6   :  { %5788 = vsyncadd [#allocation4], 4294967040 }
 0x3d7   :  { %3932 = vsyncpa [#allocation4], 1 }

</bundles_post_ra>
